<compile_context>
chip_gen: v6e
topology: v6e:2x2x1
jax: 0.10.0
libtpu: 0.0.40
codegen_flags: <defaults>
</compile_context>

<pallas_src>
import functools

import jax
import jax.numpy as jnp
from jax.experimental import pallas as pl
from jax.experimental.pallas import tpu as pltpu


def _round_up(x, m):
    return (x + m - 1) // m * m


# ---------------------------------------------------------------------------
# Pallas kernel: fused MLP forward (matmul + bias + ReLU ... + sigmoid)
# ---------------------------------------------------------------------------
def _rgbnet_kernel(dims, d_out, x_ref, wh_ref, bh_ref, wl_ref, bl_ref, out_ref):
    n_lin = len(dims) - 1                        # number of linear layers
    h = x_ref[...]                               # (tile_m, dims[0]) bf16

    # Hidden layers: y = relu(h @ W + b); f32 accumulate, bf16 dot operands.
    for i in range(n_lin - 1):
        k, n = dims[i], dims[i + 1]
        w = wh_ref[i][:k, :n]                    # (k, n) bf16   (zero-padded slot)
        b = bh_ref[i][:, :n]                     # (1, n) f32
        a = jnp.dot(h, w, preferred_element_type=jnp.float32) + b
        h = jnp.maximum(a, 0.0).astype(jnp.bfloat16)

    # Final layer computed transposed for a lane-dense output block:
    #   (d_pad, k) contracted with (tile_m, k) over k  ->  (d_pad, tile_m)
    k = dims[-2]
    s = jax.lax.dot_general(
        wl_ref[...][:, :k], h,
        dimension_numbers=(((1,), (1,)), ((), ())),
        preferred_element_type=jnp.float32)
    s = s + bl_ref[...]                          # (d_pad, 1) broadcast over lanes
    s = s[:d_out, :]                             # (d_out, tile_m)
    # sigmoid(x) = 1 / (1 + exp(-x)), divide on the EUP approx path
    out_ref[...] = pl.reciprocal(1.0 + jnp.exp(-s), approx=True)


# ---------------------------------------------------------------------------
# Wrapper
# ---------------------------------------------------------------------------
def rgbnet_forward_pallas(x, w_hidden, b_hidden, w_last, b_last, dims, *,
                          tile_m=1024):
    """x: (N, dims[0]); packed params from pack_rgbnet_params. Returns (N, d_out) f32."""
    N = x.shape[0]
    d_out = dims[-1]
    n_lin = len(dims) - 1
    grid_m = pl.cdiv(N, tile_m)                  # ragged N handled by masked tail

    if x.dtype != jnp.bfloat16:                  # ideally callers pass bf16 directly
        x = x.astype(jnp.bfloat16)

    kernel = functools.partial(_rgbnet_kernel, tuple(dims), d_out)

    flops = 2 * N * sum(dims[i] * dims[i + 1] for i in range(n_lin))
    param_bytes = sum(int(a.size) * a.dtype.itemsize
                      for a in (w_hidden, b_hidden, w_last, b_last))
    cost = pl.CostEstimate(
        flops=int(flops),
        transcendentals=int(N * d_out),
        bytes_accessed=int(x.size) * x.dtype.itemsize + N * d_out * 4 + param_bytes)

    out_t = pl.pallas_call(
        kernel,
        out_shape=jax.ShapeDtypeStruct((d_out, N), jnp.float32),
        grid_spec=pltpu.PrefetchScalarGridSpec(
            num_scalar_prefetch=0,
            grid=(grid_m,),
            in_specs=[
                pl.BlockSpec((tile_m, dims[0]), lambda i: (i, 0)),
                # constant-index params: fetched once, resident across the grid
                pl.BlockSpec(w_hidden.shape, lambda i: (0, 0, 0)),
                pl.BlockSpec(b_hidden.shape, lambda i: (0, 0, 0)),
                pl.BlockSpec(w_last.shape, lambda i: (0, 0)),
                pl.BlockSpec(b_last.shape, lambda i: (0, 0)),
            ],
            out_specs=pl.BlockSpec((d_out, tile_m), lambda i: (0, i)),
        ),
        compiler_params=pltpu.CompilerParams(
            dimension_semantics=("parallel",),
            vmem_limit_bytes=32 * 1024 * 1024),
        cost_estimate=cost,
    )(x, w_hidden, b_hidden, w_last, b_last)

    # layout plumbing back to the module's (N, d_out) convention (cheap: 12 B/pt)
    return out_t.T


# ---------------------------------------------------------------------------
# Parameter construction (mirrors RGBNet.__init__ with weight_norm, dim=0:
# effective W = g * V / ||V||_row) + packing into fused kernel buffers.
# ---------------------------------------------------------------------------
def make_rgbnet_params(key, d_in, d_out, d_hidden, d_feats, n_hidden):
    dims = [d_in + d_feats] + [d_hidden] * n_hidden + [d_out]
    weights, biases = [], []
    for i in range(len(dims) - 1):
        key, kv, kg, kb = jax.random.split(key, 4)
        fan_in, fan_out = dims[i], dims[i + 1]
        v = jax.random.normal(kv, (fan_out, fan_in), jnp.float32) * 0.2
        g = 1.0 + 0.1 * jax.random.normal(kg, (fan_out, 1), jnp.float32)
        b = 0.05 * jax.random.normal(kb, (fan_out,), jnp.float32)
        v_norm = jnp.sqrt(jnp.sum(v * v, axis=1, keepdims=True))
        weights.append(g * v / v_norm)           # (out, in), effective weight
        biases.append(b)                         # (out,)
    return dims, weights, biases


def pack_rgbnet_params(dims, weights, biases):
    """Pack per-layer params into fused, zero-padded, kernel-friendly buffers."""
    n_lin = len(dims) - 1
    assert n_lin >= 2, "need at least one hidden layer"
    S = max(dims)                                # square parameter slot
    d_out = dims[-1]
    d_pad = _round_up(d_out, 8)

    w_hidden = jnp.zeros((n_lin - 1, S, S), jnp.float32)
    b_hidden = jnp.zeros((n_lin - 1, 1, S), jnp.float32)
    for i in range(n_lin - 1):
        k, n = dims[i], dims[i + 1]
        w_hidden = w_hidden.at[i, :k, :n].set(weights[i].T)   # stored (in, out)
        b_hidden = b_hidden.at[i, 0, :n].set(biases[i])
    w_last = jnp.zeros((d_pad, S), jnp.float32)
    w_last = w_last.at[:d_out, :dims[-2]].set(weights[-1])    # stored (out, in)
    b_last = jnp.zeros((d_pad, 1), jnp.float32)
    b_last = b_last.at[:d_out, 0].set(biases[-1])
    return (w_hidden.astype(jnp.bfloat16), b_hidden,
            w_last.astype(jnp.bfloat16), b_last)


# ---------------------------------------------------------------------------
# Pure-JAX f32 reference (same math) for correctness
# ---------------------------------------------------------------------------
def rgbnet_forward_ref(x, weights, biases):
    h = x
    L = len(weights)
    for i, (w, b) in enumerate(zip(weights, biases)):
        h = h @ w.T + b
        if i < L - 1:
            h = jnp.maximum(h, 0.0)
    return jax.nn.sigmoid(h)


if __name__ == "__main__":
    # multires = 0 => no embedder (the multires>0 positional embedder is not
    # part of this kernel).
    d_in, d_out, d_hidden, d_feats, n_hidden = 9, 3, 32, 16, 2

    key = jax.random.PRNGKey(0)
    key, kparam = jax.random.split(key)
    dims, weights, biases = make_rgbnet_params(
        kparam, d_in, d_out, d_hidden, d_feats, n_hidden)
    w_hidden, b_hidden, w_last, b_last = pack_rgbnet_params(dims, weights, biases)

    # Reference uses the same bf16-rounded weights, upcast to f32.
    weights_r = [w.astype(jnp.bfloat16).astype(jnp.float32) for w in weights]

    ok = True
    for N, tile_m in [(4096, 1024), (2500, 1024)]:     # divisible grid + ragged tail
        key, kp, kn, kv, kf = jax.random.split(key, 5)
        points = jax.random.normal(kp, (N, 3), jnp.float32)
        normals = jax.random.normal(kn, (N, 3), jnp.float32)
        view_dirs = jax.random.normal(kv, (N, 3), jnp.float32)
        feats = jax.random.normal(kf, (N, d_feats), jnp.float32)

        # forward(): X = cat([points, view_dirs, normals, feats], dim=-1)
        X = jnp.concatenate([points, view_dirs, normals, feats], axis=-1)
        X_bf = X.astype(jnp.bfloat16)                  # bf16 feed halves HBM read

        out = rgbnet_forward_pallas(X_bf, w_hidden, b_hidden, w_last, b_last,
                                    dims, tile_m=tile_m)
        out = jax.block_until_ready(out)

        ref = rgbnet_forward_ref(X_bf.astype(jnp.float32), weights_r, biases)
        ok = ok and (out.shape == (N, d_out))
        ok = ok and bool(jnp.allclose(out, ref, atol=2e-2, rtol=0.0))

    assert ok, "mismatch vs reference"
    print("KERNEL_OK")
</pallas_src>

<mosaic_0001>
module attributes {stable_mosaic.version = 11 : i64} {
  func.func @_rgbnet_kernel(%arg0: i32, %arg1: memref<1024x25xbf16, #tpu.memory_space<vmem>>, %arg2: memref<2x32x32xbf16, #tpu.memory_space<vmem>>, %arg3: memref<2x1x32xf32, #tpu.memory_space<vmem>>, %arg4: memref<8x32xbf16, #tpu.memory_space<vmem>>, %arg5: memref<8x1xf32, #tpu.memory_space<vmem>>, %arg6: memref<3x1024xf32, #tpu.memory_space<vmem>>) attributes {dimension_semantics = [#tpu.dimension_semantics<parallel>], iteration_bounds = array<i64: 4>, scalar_prefetch = 0 : i64, scratch_operands = 0 : i64, tpu.core_type = #tpu.core_type<tc>, window_params = [{transform_indices = @transform_0, window_bounds = array<i64: 1024, 25>}, {pipeline_mode = #tpu.pipeline_mode<synchronous>, transform_indices = @transform_1, window_bounds = array<i64: 2, 32, 32>}, {pipeline_mode = #tpu.pipeline_mode<synchronous>, transform_indices = @transform_2, window_bounds = array<i64: 2, 1, 32>}, {pipeline_mode = #tpu.pipeline_mode<synchronous>, transform_indices = @transform_3, window_bounds = array<i64: 8, 32>}, {pipeline_mode = #tpu.pipeline_mode<synchronous>, transform_indices = @transform_4, window_bounds = array<i64: 8, 1>}, {transform_indices = @transform_5, window_bounds = array<i64: 3, 1024>}]} {
    %c0 = arith.constant 0 : index
    %c0_0 = arith.constant 0 : index
    %0 = vector.load %arg1[%c0, %c0_0] : memref<1024x25xbf16, #tpu.memory_space<vmem>>, vector<1024x25xbf16>
    %c0_1 = arith.constant 0 : index
    %c0_2 = arith.constant 0 : index
    %c0_3 = arith.constant 0 : index
    %1 = vector.load %arg2[%c0_1, %c0_2, %c0_3] : memref<2x32x32xbf16, #tpu.memory_space<vmem>>, vector<1x32x32xbf16>
    %2 = vector.shape_cast %1 : vector<1x32x32xbf16> to vector<32x32xbf16>
    %3 = vector.extract_strided_slice %2 {offsets = [0, 0], sizes = [25, 32], strides = [1, 1]} : vector<32x32xbf16> to vector<25x32xbf16>
    %c0_4 = arith.constant 0 : index
    %c0_5 = arith.constant 0 : index
    %c0_6 = arith.constant 0 : index
    %4 = vector.load %arg3[%c0_4, %c0_5, %c0_6] : memref<2x1x32xf32, #tpu.memory_space<vmem>>, vector<1x1x32xf32>
    %5 = vector.shape_cast %4 : vector<1x1x32xf32> to vector<1x32xf32>
    %cst = arith.constant dense<0.000000e+00> : vector<1024x32xf32>
    %6 = tpu.matmul %0, %3, %cst {dimension_numbers = #tpu.dot_dimension_numbers<[1], [0], [0], [1], [0, 0, 1, 1], [], []>} : vector<1024x25xbf16>, vector<25x32xbf16>, vector<1024x32xf32> -> vector<1024x32xf32>
    %7 = vector.broadcast %5 : vector<1x32xf32> to vector<1024x32xf32>
    %8 = arith.addf %6, %7 : vector<1024x32xf32>
    %cst_7 = arith.constant 0.000000e+00 : f32
    %9 = vector.broadcast %cst_7 : f32 to vector<1024x32xf32>
    %10 = arith.maximumf %8, %9 : vector<1024x32xf32>
    %11 = arith.truncf %10 : vector<1024x32xf32> to vector<1024x32xbf16>
    %c1 = arith.constant 1 : index
    %c0_8 = arith.constant 0 : index
    %c0_9 = arith.constant 0 : index
    %12 = vector.load %arg2[%c1, %c0_8, %c0_9] : memref<2x32x32xbf16, #tpu.memory_space<vmem>>, vector<1x32x32xbf16>
    %13 = vector.shape_cast %12 : vector<1x32x32xbf16> to vector<32x32xbf16>
    %c1_10 = arith.constant 1 : index
    %c0_11 = arith.constant 0 : index
    %c0_12 = arith.constant 0 : index
    %14 = vector.load %arg3[%c1_10, %c0_11, %c0_12] : memref<2x1x32xf32, #tpu.memory_space<vmem>>, vector<1x1x32xf32>
    %15 = vector.shape_cast %14 : vector<1x1x32xf32> to vector<1x32xf32>
    %cst_13 = arith.constant dense<0.000000e+00> : vector<1024x32xf32>
    %16 = tpu.matmul %11, %13, %cst_13 {dimension_numbers = #tpu.dot_dimension_numbers<[1], [0], [0], [1], [0, 0, 1, 1], [], []>} : vector<1024x32xbf16>, vector<32x32xbf16>, vector<1024x32xf32> -> vector<1024x32xf32>
    %17 = vector.broadcast %15 : vector<1x32xf32> to vector<1024x32xf32>
    %18 = arith.addf %16, %17 : vector<1024x32xf32>
    %cst_14 = arith.constant 0.000000e+00 : f32
    %19 = vector.broadcast %cst_14 : f32 to vector<1024x32xf32>
    %20 = arith.maximumf %18, %19 : vector<1024x32xf32>
    %21 = arith.truncf %20 : vector<1024x32xf32> to vector<1024x32xbf16>
    %c0_15 = arith.constant 0 : index
    %c0_16 = arith.constant 0 : index
    %22 = vector.load %arg4[%c0_15, %c0_16] : memref<8x32xbf16, #tpu.memory_space<vmem>>, vector<8x32xbf16>
    %cst_17 = arith.constant dense<0.000000e+00> : vector<8x1024xf32>
    %23 = tpu.matmul %22, %21, %cst_17 {dimension_numbers = #tpu.dot_dimension_numbers<[1], [1], [0], [0], [0, 0, 1, 0], [], []>} : vector<8x32xbf16>, vector<1024x32xbf16>, vector<8x1024xf32> -> vector<8x1024xf32>
    %c0_18 = arith.constant 0 : index
    %c0_19 = arith.constant 0 : index
    %24 = vector.load %arg5[%c0_18, %c0_19] : memref<8x1xf32, #tpu.memory_space<vmem>>, vector<8x1xf32>
    %25 = vector.broadcast %24 : vector<8x1xf32> to vector<8x1024xf32>
    %26 = arith.addf %23, %25 : vector<8x1024xf32>
    %27 = vector.extract_strided_slice %26 {offsets = [0, 0], sizes = [3, 1024], strides = [1, 1]} : vector<8x1024xf32> to vector<3x1024xf32>
    %cst_20 = arith.constant 0.000000e+00 : f32
    %28 = vector.broadcast %cst_20 : f32 to vector<3x1024xf32>
    %29 = arith.subf %28, %27 : vector<3x1024xf32>
    %30 = math.exp %29 : vector<3x1024xf32>
    %cst_21 = arith.constant 1.000000e+00 : f32
    %31 = vector.broadcast %cst_21 : f32 to vector<3x1024xf32>
    %32 = arith.addf %31, %30 : vector<3x1024xf32>
    %33 = tpu.reciprocal %32 {approx = true} : vector<3x1024xf32> -> vector<3x1024xf32>
    %c0_22 = arith.constant 0 : index
    %c0_23 = arith.constant 0 : index
    %34 = vector.load %arg6[%c0_22, %c0_23] : memref<3x1024xf32, #tpu.memory_space<vmem>>, vector<3x1024xf32>
    tpu.vector_store %arg6[%c0_22, %c0_23], %33 {strides = array<i32>} : memref<3x1024xf32, #tpu.memory_space<vmem>>, vector<3x1024xf32>,
    return
  }
  func.func @transform_0(%arg0: i32) -> (i32, i32) {
    %c0_i32 = arith.constant 0 : i32
    %c0_i32_0 = arith.constant 0 : i32
    return %arg0, %c0_i32 : i32, i32
  }
  func.func @transform_1(%arg0: i32) -> (i32, i32, i32) {
    %c0_i32 = arith.constant 0 : i32
    %c0_i32_0 = arith.constant 0 : i32
    %c0_i32_1 = arith.constant 0 : i32
    %c0_i32_2 = arith.constant 0 : i32
    return %c0_i32, %c0_i32_0, %c0_i32_1 : i32, i32, i32
  }
  func.func @transform_2(%arg0: i32) -> (i32, i32, i32) {
    %c0_i32 = arith.constant 0 : i32
    %c0_i32_0 = arith.constant 0 : i32
    %c0_i32_1 = arith.constant 0 : i32
    %c0_i32_2 = arith.constant 0 : i32
    return %c0_i32, %c0_i32_0, %c0_i32_1 : i32, i32, i32
  }
  func.func @transform_3(%arg0: i32) -> (i32, i32) {
    %c0_i32 = arith.constant 0 : i32
    %c0_i32_0 = arith.constant 0 : i32
    %c0_i32_1 = arith.constant 0 : i32
    return %c0_i32, %c0_i32_0 : i32, i32
  }
  func.func @transform_4(%arg0: i32) -> (i32, i32) {
    %c0_i32 = arith.constant 0 : i32
    %c0_i32_0 = arith.constant 0 : i32
    %c0_i32_1 = arith.constant 0 : i32
    return %c0_i32, %c0_i32_0 : i32, i32
  }
  func.func @transform_5(%arg0: i32) -> (i32, i32) {
    %c0_i32 = arith.constant 0 : i32
    %c0_i32_0 = arith.constant 0 : i32
    return %c0_i32, %arg0 : i32, i32
  }
}

</mosaic_0001>

<bundles_post_ra>
// kernel: tpu_custom_call.1
= control target key start
LH: loop header
LB: loop body
LE: loop exit
PB: predicated region body
PF: predicated region fallthrough
CT: control target
= control target key end

     0   :  { %10 = vsyncpa [#allocation3], 0  ;;  %s4917_s0 = inlined_call_operand.vmem [shape: bf16[4096,25], index: 0, kind: input, shape index: {}]   ;;  %s4918_s1 = inlined_call_operand.vmem [shape: bf16[2,32,32], index: 1, kind: input, shape index: {}]   ;;  %s4919_s2 = inlined_call_operand.vmem [shape: f32[2,1,32], index: 2, kind: input, shape index: {}]   ;;  %s4920_s3 = inlined_call_operand.vmem [shape: bf16[8,32], index: 3, kind: input, shape index: {}]   ;;  %s4921_s4 = inlined_call_operand.vmem [shape: f32[8,1], index: 4, kind: input, shape index: {}]   ;;  %s4922_s5 = inlined_call_operand.hbm [shape: f32[3,4096], index: 5, kind: output, shape index: {}]  }
   0x1   :  { %12 = vsyncpa [#allocation3 + $0x1], 0  ;;  %s4048_s18 = smov 0   ;;  %s4050_s19 = smov 0  }
   0x2   :  { %s4052_s20 = smov 0   ;;  %s4054_s21 = smov 0  }
   0x3 LB: > { %s4069_s22 = sadd.s32 4294967295, %s4013_s21   ;;  %s3089_s23 = sadd.s32 4294967294, %s4013_s21   ;;  %s4013_s21 = sphi %s4054_s21, %s4928_s21   ;;  %s4009_s20 = sphi %s4052_s20, %s4927_s20   ;;  %s4005_s19 = sphi %s4050_s19, %s4926_s19   ;;  %s4001_s18 = sphi %s4048_s18, %s4925_s18  }
   0x4   : > { %s4073_s24 = sadd.s32 1, %s4013_s21   ;;  %s135_s25 = sadd.s32 1, %s4009_s20 }
   0x5   : > { %s132_s26 = ssub.s32 %s4013_s21, %s4073_s24  ;;  %p145_p0 = scmp.ne.s32.totalorder %s4009_s20, %s4005_s19 }
   0x6   : > { %p133_p1 = scmp.eq.s32.totalorder %s132_s26, 0  ;;  %p146_p2 = scmp.eq.s32.totalorder %s4069_s22, 3 }
   0x7   : > { %p151_p3 = scmp.ne.s32.totalorder %s4005_s19, %s4001_s18  ;;  %p152_p4 = scmp.eq.s32.totalorder %s3089_s23, 3 }
   0x8   : > { %s4084_s27 = scalar_select %p133_p1, %s4009_s20, %s135_s25  }
   0x9   : > { %p4086_p5 = por %p146_p2, %p145_p0  ;;  %p4090_p6 = por %p152_p4, %p151_p3 }
   0xa   : > { %p3092_p7 = scmp.ge.s32.totalorder %s4013_s21, 1  ;;  %p191_p8 = scmp.lt.s32.totalorder %s4013_s21, 5 }
   0xc   : > { %p192_p9 = pnand %p3092_p7, %p191_p8 }
   0xd   : > { %s3094_s7 = sshll.u32 (!%p192_p9), %s4069_s22, 7  ;;  %s216_s14 = sand.u32 (!%p192_p9), 1, %s4005_s19  }
   0xe   : > { %195 = sbr.rel (%p192_p9) target bundleno = 999 (0x3e7), region = 40  ;;  %p220_p10 = scmp.lt.s32.totalorder (!%p192_p9), %s3094_s7, 511 }
   0xf   : > { %s3093_s15 = sshll.u32 (!%p192_p9), %s216_s14, 5  ;;  %s3308_s17 = sshll.u32 (!%p192_p9), %s4069_s22, 9 }
  0x10   : > { %s4869_s16 = scalar_lea.vmem (!%p192_p9), [#allocation2], %s3093_s15  ;;  %s3028_s30 = scalar_lea.hbm (!%p192_p9), %s4922_s5, %s3308_s17 }
  0x11   : > { %s3030_s23 = sshll.u32 (!%p192_p9), %s4869_s16, 4  ;;  %s3016_s6 = scalar_lea.sflag (!%p192_p9), [#allocation3], %s216_s14  ;;  %s3031_s23 = int_to_ptr.vmem [resolvable:$true] %s3030_s23 }
  0x12   : > { %s4017_s8 = smov (!%p192_p9), [#allocation2]  }
  0x13   : > { %v3851_v0 = vld [vmem:[%s4918_s1 + $0x8] sm:$0xff]   ;;  %vm890_vm0 = vcmask 1043456   ;;  %vm891_vm1 = vcmask 1044480   ;;  %v4015_v1 = vmov 65535   ;;  %v3852_v5 = vld [vmem:[%s4918_s1] sm:$0xff]   ;;  %s4930_s7 = smov (!%p220_p10, %s3094_s7), 511 }
  0x14   : > { %v892_v2 = vsel %vm890_vm0, 4294967295, %v4015_v1  ;;  %s3095_s10 = sshll.u32 %s4930_s7, 2  ;;  %vm697_vm2 = vcmask 203776   ;;  %v3903_v26 = vld [vmem:[%s4918_s1 + $0x18] sm:$0xff]   ;;  %v3904_v28 = vld [vmem:[%s4918_s1 + $0x10] sm:$0xff]   ;;  %vm1659_vm3 = vcmask 261120  }
  0x15   : > { %v893_v3 = vsel %vm891_vm1, %v892_v2, 0  ;;  %s4106_s13 = scalar_lea.vmem %s4917_s0, %s3095_s10  ;;  %3645 = vmatprep.subr.bf16.mxu1 %v3903_v26  ;;  %v4219_v61 = vld [vmem:[%s4919_s2] ss:$0 sm:$0xff]  ;;  %s3953_s7 = scalar_lea.vmem %s3031_s23, 512 }
  0x16   : > { %v895_v4 = vand.u32 %v3851_v0, %v893_v3  ;;  %v3853_v6 = vld [vmem:[%s4106_s13] sm:$0xff]   ;;  %v3854_v7 = vld [vmem:[%s4106_s13 + $0x8] sm:$0xff]   ;;  %v3855_v8 = vld [vmem:[%s4106_s13 + $0x10] sm:$0xff]   ;;  %3646 = vmatpush3.bf16.msra.mxu1 %v3903_v26  ;;  %p3954_p11 = scmp.ne.s32.totalorder %s3031_s23, %s3953_s7  ;;  %s3957_s9 = sshll.u32 %s4017_s8, 4  ;;  %s3958_s9 = int_to_ptr.vmem [resolvable:$false] %s3957_s9 }
  0x17   : > { %3517 = vmatprep.mubr.msk.bf16.mxu0 %vm697_vm2, %v3853_v6  ;;  %v3856_v9 = vld [vmem:[%s4106_s13 + $0x18] sm:$0xff]   ;;  %v3857_v10 = vld [vmem:[%s4106_s13 + $0x20] sm:$0xff]   ;;  %v3858_v11 = vld [vmem:[%s4106_s13 + $0x28] sm:$0xff]   ;;  %3647 = vmatprep.subr.bf16.mxu1 %v3904_v28  ;;  %s3959_s22 = scalar_lea.vmem %s3958_s9, 1024  ;;  %p3960_p0 = scmp.lt.s32.totalorder %s3031_s23, %s3958_s9 }
  0x18   : > { %3513 = vmatprep.subr.bf16.mxu0 %v895_v4  ;;  %v3859_v12 = vld [vmem:[%s4106_s13 + $0x30] sm:$0xff]   ;;  %v3860_v13 = vld [vmem:[%s4106_s13 + $0x38] sm:$0xff]   ;;  %v3861_v14 = vld [vmem:[%s4106_s13 + $0x40] sm:$0xff]   ;;  %p3955_p12 = pnand %p3954_p11, %p4086_p5  ;;  %p3961_p1 = scmp.lt.s32.totalorder %s3959_s22, %s3953_s7 }
  0x19   : > { %3514 = vmatpush3.bf16.msra.mxu0 %v895_v4  ;;  %v3862_v15 = vld [vmem:[%s4106_s13 + $0x48] sm:$0xff]   ;;  %v3863_v16 = vld [vmem:[%s4106_s13 + $0x50] sm:$0xff]   ;;  %v3864_v17 = vld [vmem:[%s4106_s13 + $0x58] sm:$0xff]  }
  0x1a   : > { %3515 = vmatprep.subr.bf16.mxu0 %v3852_v5  ;;  %v3865_v18 = vld [vmem:[%s4106_s13 + $0x60] sm:$0xff]   ;;  %v3866_v19 = vld [vmem:[%s4106_s13 + $0x68] sm:$0xff]   ;;  %v3867_v20 = vld [vmem:[%s4106_s13 + $0x70] sm:$0xff]   ;;  %3648 = vmatpush3.bf16.msra.mxu1 %v3904_v28  ;;  %p3956_p13 = pneg %p3955_p12  ;;  %p3962_p2 = por %p3961_p1, %p3960_p0 }
  0x1b   : > { %v3868_v21 = vld [vmem:[%s4106_s13 + $0x78] sm:$0xff]   ;;  %v3869_v22 = vld [vmem:[%s4106_s13 + $0x80] sm:$0xff]   ;;  %v3870_v23 = vld [vmem:[%s4106_s13 + $0x88] sm:$0xff]  }
  0x1c   : > { %v3871_v24 = vld [vmem:[%s4106_s13 + $0x90] sm:$0xff]   ;;  %v3872_v25 = vld [vmem:[%s4106_s13 + $0x98] sm:$0xff]   ;;  %v3873_v27 = vld [vmem:[%s4106_s13 + $0xa0] sm:$0xff]   ;;  %p3963_p3 = pnand %p3962_p2, %p3956_p13 }
  0x1d   : > { %3516 = vmatpush3.bf16.msra.mxu0 %v3852_v5  ;;  %v3874_v29 = vld [vmem:[%s4106_s13 + $0xa8] sm:$0xff]   ;;  %v3875_v30 = vld [vmem:[%s4106_s13 + $0xb0] sm:$0xff]   ;;  %v3876_v31 = vld [vmem:[%s4106_s13 + $0xb8] sm:$0xff]  }
  0x1e   : > { %v3877_v32 = vld [vmem:[%s4106_s13 + $0xc0] sm:$0xff]   ;;  %v3878_v33 = vld [vmem:[%s4106_s13 + $0xc8] sm:$0xff]   ;;  %v3879_v34 = vld [vmem:[%s4106_s13 + $0xd0] sm:$0xff]  }
  0x1f   : > { %v3880_v35 = vld [vmem:[%s4106_s13 + $0xd8] sm:$0xff]   ;;  %v3881_v36 = vld [vmem:[%s4106_s13 + $0xe0] sm:$0xff]   ;;  %v3882_v37 = vld [vmem:[%s4106_s13 + $0xe8] sm:$0xff]  }
  0x20   : > { %3518 = vmatmul.mubr.msk.bf16.vlgmr.msra.gmra.mxu0 %vm697_vm2, %v3854_v7  ;;  %v3883_v38 = vld [vmem:[%s4106_s13 + $0xf0] sm:$0xff]   ;;  %v3884_v39 = vld [vmem:[%s4106_s13 + $0xf8] sm:$0xff]   ;;  %v3885_v40 = vld [vmem:[%s4106_s13 + $0x100] sm:$0xff]  }
  0x21   : > { %3521 = vmatprep.mubr.msk.bf16.mxu0 %vm697_vm2, %v3855_v8  ;;  %v3886_v41 = vld [vmem:[%s4106_s13 + $0x108] sm:$0xff]   ;;  %v3887_v42 = vld [vmem:[%s4106_s13 + $0x110] sm:$0xff]   ;;  %v3888_v43 = vld [vmem:[%s4106_s13 + $0x118] sm:$0xff]  }
  0x22   : > { %v3889_v44 = vld [vmem:[%s4106_s13 + $0x120] sm:$0xff]   ;;  %v3890_v45 = vld [vmem:[%s4106_s13 + $0x128] sm:$0xff]   ;;  %v3891_v46 = vld [vmem:[%s4106_s13 + $0x130] sm:$0xff]  }
  0x23   : > { %v3892_v47 = vld [vmem:[%s4106_s13 + $0x138] sm:$0xff]   ;;  %v3893_v48 = vld [vmem:[%s4106_s13 + $0x140] sm:$0xff]   ;;  %v3894_v49 = vld [vmem:[%s4106_s13 + $0x148] sm:$0xff]  }
  0x24   : > { %v3895_v50 = vld [vmem:[%s4106_s13 + $0x150] sm:$0xff]   ;;  %v3896_v51 = vld [vmem:[%s4106_s13 + $0x158] sm:$0xff]   ;;  %v3897_v52 = vld [vmem:[%s4106_s13 + $0x160] sm:$0xff]  }
  0x25   : > { %v3898_v53 = vld [vmem:[%s4106_s13 + $0x168] sm:$0xff]   ;;  %v3899_v54 = vld [vmem:[%s4106_s13 + $0x170] sm:$0xff]   ;;  %v3900_v55 = vld [vmem:[%s4106_s13 + $0x178] sm:$0xff]  }
  0x26   : > { %v3901_v56 = vld [vmem:[%s4106_s13 + $0x180] sm:$0xff]   ;;  %v3902_v57 = vld [vmem:[%s4106_s13 + $0x188] sm:$0xff]   ;;  %v3905_v58 = vld [vmem:[%s4106_s13 + $0x190] sm:$0xff]  }
  0x27   : > { %v3906_v63 = vld [vmem:[%s4106_s13 + $0x198] sm:$0xff]   ;;  %v3907_v2 = vld [vmem:[%s4106_s13 + $0x1a0] sm:$0xff]  }
  0x28   : > { %3522 = vmatmul.mubr.msk.bf16.gmra.mxu0 %vm697_vm2, %v3856_v9 }
  0x29   : > { %3525 = vmatprep.mubr.msk.bf16.mxu0 %vm697_vm2, %v3857_v10 }
  0x30   : > { %3526 = vmatmul.mubr.msk.bf16.gmra.mxu0 %vm697_vm2, %v3858_v11 }
  0x31   : > { %3529 = vmatprep.mubr.msk.bf16.mxu0 %vm697_vm2, %v3859_v12 }
  0x38   : > { %3530 = vmatmul.mubr.msk.bf16.gmra.mxu0 %vm697_vm2, %v3860_v13 }
  0x39   : > { %3533 = vmatprep.mubr.msk.bf16.mxu0 %vm697_vm2, %v3861_v14 }
  0x40   : > { %3534 = vmatmul.mubr.msk.bf16.gmra.mxu0 %vm697_vm2, %v3862_v15  ;;  %v3908_v15 = vld [vmem:[%s4106_s13 + $0x1a8] sm:$0xff]  }
  0x41   : > { %3537 = vmatprep.mubr.msk.bf16.mxu0 %vm697_vm2, %v3863_v16 }
  0x48   : > { %3538 = vmatmul.mubr.msk.bf16.gmra.mxu0 %vm697_vm2, %v3864_v17 }
  0x49   : > { %3541 = vmatprep.mubr.msk.bf16.mxu0 %vm697_vm2, %v3865_v18  ;;  %v3909_v18 = vld [vmem:[%s4106_s13 + $0x1b0] sm:$0xff]  }
  0x50   : > { %3542 = vmatmul.mubr.msk.bf16.gmra.mxu0 %vm697_vm2, %v3866_v19 }
  0x51   : > { %3545 = vmatprep.mubr.msk.bf16.mxu0 %vm697_vm2, %v3867_v20 }
  0x58   : > { %3546 = vmatmul.mubr.msk.bf16.gmra.mxu0 %vm697_vm2, %v3868_v21 }
  0x59   : > { %3549 = vmatprep.mubr.msk.bf16.mxu0 %vm697_vm2, %v3869_v22 }
  0x60   : > { %3550 = vmatmul.mubr.msk.bf16.gmra.mxu0 %vm697_vm2, %v3870_v23 }
  0x61   : > { %3553 = vmatprep.mubr.msk.bf16.mxu0 %vm697_vm2, %v3871_v24 }
  0x68   : > { %3554 = vmatmul.mubr.msk.bf16.gmra.mxu0 %vm697_vm2, %v3872_v25 }
  0x69   : > { %3557 = vmatprep.mubr.msk.bf16.mxu0 %vm697_vm2, %v3873_v27 }
  0x70   : > { %3558 = vmatmul.mubr.msk.bf16.gmra.mxu0 %vm697_vm2, %v3874_v29 }
  0x71   : > { %3561 = vmatprep.mubr.msk.bf16.mxu0 %vm697_vm2, %v3875_v30 }
  0x78   : > { %3562 = vmatmul.mubr.msk.bf16.gmra.mxu0 %vm697_vm2, %v3876_v31  ;;  %v3910_v31 = vld [vmem:[%s4106_s13 + $0x1b8] sm:$0xff]  }
  0x79   : > { %3565 = vmatprep.mubr.msk.bf16.mxu0 %vm697_vm2, %v3877_v32 }
  0x80   : > { %3566 = vmatmul.mubr.msk.bf16.gmra.mxu0 %vm697_vm2, %v3878_v33 }
  0x81   : > { %3569 = vmatprep.mubr.msk.bf16.mxu0 %vm697_vm2, %v3879_v34  ;;  %v3911_v34 = vld [vmem:[%s4106_s13 + $0x1c0] sm:$0xff]  }
  0x88   : > { %3570 = vmatmul.mubr.msk.bf16.gmra.mxu0 %vm697_vm2, %v3880_v35 }
  0x89   : > { %3573 = vmatprep.mubr.msk.bf16.mxu0 %vm697_vm2, %v3881_v36 }
  0x90   : > { %3574 = vmatmul.mubr.msk.bf16.gmra.mxu0 %vm697_vm2, %v3882_v37 }
  0x91   : > { %3577 = vmatprep.mubr.msk.bf16.mxu0 %vm697_vm2, %v3883_v38 }
  0x98   : > { %3578 = vmatmul.mubr.msk.bf16.gmra.mxu0 %vm697_vm2, %v3884_v39 }
  0x99   : > { %3581 = vmatprep.mubr.msk.bf16.mxu0 %vm697_vm2, %v3885_v40 }
  0xa0   : > { %3582 = vmatmul.mubr.msk.bf16.gmra.mxu0 %vm697_vm2, %v3886_v41 }
  0xa1   : > { %3585 = vmatprep.mubr.msk.bf16.mxu0 %vm697_vm2, %v3887_v42 }
  0xa8   : > { %3586 = vmatmul.mubr.msk.bf16.gmra.mxu0 %vm697_vm2, %v3888_v43 }
  0xa9   : > { %3589 = vmatprep.mubr.msk.bf16.mxu0 %vm697_vm2, %v3889_v44 }
  0xb0   : > { %3590 = vmatmul.mubr.msk.bf16.gmra.mxu0 %vm697_vm2, %v3890_v45 }
  0xb1   : > { %3593 = vmatprep.mubr.msk.bf16.mxu0 %vm697_vm2, %v3891_v46 }
  0xb8   : > { %3594 = vmatmul.mubr.msk.bf16.gmra.mxu0 %vm697_vm2, %v3892_v47  ;;  %v3912_v47 = vld [vmem:[%s4106_s13 + $0x1c8] sm:$0xff]  }
  0xb9   : > { %3597 = vmatprep.mubr.msk.bf16.mxu0 %vm697_vm2, %v3893_v48 }
  0xc0   : > { %3598 = vmatmul.mubr.msk.bf16.gmra.mxu0 %vm697_vm2, %v3894_v49 }
  0xc1   : > { %3601 = vmatprep.mubr.msk.bf16.mxu0 %vm697_vm2, %v3895_v50  ;;  %v3913_v50 = vld [vmem:[%s4106_s13 + $0x1d0] sm:$0xff]  }
  0xc8   : > { %3602 = vmatmul.mubr.msk.bf16.gmra.mxu0 %vm697_vm2, %v3896_v51 }
  0xc9   : > { %3605 = vmatprep.mubr.msk.bf16.mxu0 %vm697_vm2, %v3897_v52 }
  0xd0   : > { %3606 = vmatmul.mubr.msk.bf16.gmra.mxu0 %vm697_vm2, %v3898_v53 }
  0xd1   : > { %3609 = vmatprep.mubr.msk.bf16.mxu0 %vm697_vm2, %v3899_v54 }
  0xd8   : > { %3610 = vmatmul.mubr.msk.bf16.gmra.mxu0 %vm697_vm2, %v3900_v55 }
  0xd9   : > { %3613 = vmatprep.mubr.msk.bf16.mxu0 %vm697_vm2, %v3901_v56 }
  0xe0   : > { %v3519_v59 = vpop.f32.mrf.mxu0  ;;  %3614 = vmatmul.mubr.msk.bf16.gmra.mxu0 %vm697_vm2, %v3902_v57 }
  0xe1   : > { %3617 = vmatprep.mubr.msk.bf16.mxu0 %vm697_vm2, %v3905_v58  ;;  %v940_v3 = vadd.f32 %v3519_v59, %v4219_v61 }
  0xe2   : > { %v931_v60 = vpop.f32.mrf.mxu0 }
  0xe3   : > { %v932_v0 = vadd.f32 %v4219_v61, %v931_v60  ;;  %v1444_v10 = vmax.f32 %v940_v3, 0.0  ;;  %v3915_v3 = vld [vmem:[%s4106_s13 + $0x1e0] sm:$0xff]  }
  0xe4   : > { %v3520_v62 = vpop.f32.mrf.mxu0 }
  0xe5   : > { %v943_v1 = vadd.f32 %v3520_v62, %v4219_v61  ;;  %v1442_v8 = vmax.f32 %v932_v0, 0.0  ;;  %v3914_v0 = vld [vmem:[%s4106_s13 + $0x1d8] sm:$0xff]  }
  0xe6   : > { %v934_v4 = vpop.f32.mrf.mxu0 }
  0xe7   : > { %v935_v5 = vadd.f32 %v4219_v61, %v934_v4  ;;  %v1445_v6 = vmax.f32 %v943_v1, 0.0 }
  0xe8   : > { %v3523_v7 = vpop.f32.mrf.mxu0  ;;  %3618 = vmatmul.mubr.msk.bf16.gmra.mxu0 %vm697_vm2, %v3906_v63 }
  0xe9   : > { %v1443_v9 = vmax.f32 %v935_v5, 0.0  ;;  %3621 = vmatprep.mubr.msk.bf16.mxu0 %vm697_vm2, %v3907_v2  ;;  %v1571_v13 = vpack.c.bf16 %v1445_v6, %v1444_v10  ;;  %v956_v19 = vadd.f32 %v3523_v7, %v4219_v61 }
  0xea   : > { %v947_v11 = vpop.f32.mrf.mxu0 }
  0xeb   : > { %v1570_v12 = vpack.c.bf16 %v1443_v9, %v1442_v8  ;;  %v948_v16 = vadd.f32 %v4219_v61, %v947_v11  ;;  %v1448_v26 = vmax.f32 %v956_v19, 0.0  ;;  %v3917_v19 = vld [vmem:[%s4106_s13 + $0x1f0] sm:$0xff]  }
  0xec   : > { %v3524_v14 = vpop.f32.mrf.mxu0 }
  0xed   : > { %v959_v17 = vadd.f32 %v3524_v14, %v4219_v61  ;;  %3649 = vmatprep.mubr.msk.bf16.mxu1 %vm1659_vm3, %v1570_v12  ;;  %v1446_v24 = vmax.f32 %v948_v16, 0.0  ;;  %v3916_v16 = vld [vmem:[%s4106_s13 + $0x1e8] sm:$0xff]  }
  0xee   : > { %v950_v20 = vpop.f32.mrf.mxu0  ;;  %3650 = vmatmul.mubr.msk.bf16.vlgmr.msra.gmra.mxu1 %vm1659_vm3, %v1571_v13 }
  0xef   : > { %v951_v21 = vadd.f32 %v4219_v61, %v950_v20  ;;  %v1449_v22 = vmax.f32 %v959_v17, 0.0 }
  0xf0   : > { %v3527_v23 = vpop.f32.mrf.mxu0  ;;  %3622 = vmatmul.mubr.msk.bf16.gmra.mxu0 %vm697_vm2, %v3908_v15 }
  0xf1   : > { %v1447_v25 = vmax.f32 %v951_v21, 0.0  ;;  %3625 = vmatprep.mubr.msk.bf16.mxu0 %vm697_vm2, %v3909_v18  ;;  %v1573_v29 = vpack.c.bf16 %v1449_v22, %v1448_v26  ;;  %v972_v35 = vadd.f32 %v3527_v23, %v4219_v61 }
  0xf2   : > { %v963_v27 = vpop.f32.mrf.mxu0 }
  0xf3   : > { %v1572_v28 = vpack.c.bf16 %v1447_v25, %v1446_v24  ;;  %v964_v32 = vadd.f32 %v4219_v61, %v963_v27  ;;  %v1452_v42 = vmax.f32 %v972_v35, 0.0 }
  0xf4   : > { %v3528_v30 = vpop.f32.mrf.mxu0 }
  0xf5   : > { %v975_v33 = vadd.f32 %v3528_v30, %v4219_v61  ;;  %3653 = vmatprep.mubr.msk.bf16.mxu1 %vm1659_vm3, %v1572_v28  ;;  %v1450_v40 = vmax.f32 %v964_v32, 0.0  ;;  %v3918_v32 = vld [vmem:[%s4106_s13 + $0x1f8] sm:$0xff]  }
  0xf6   : > { %v966_v36 = vpop.f32.mrf.mxu0  ;;  %3654 = vmatmul.mubr.msk.bf16.gmra.mxu1 %vm1659_vm3, %v1573_v29 }
  0xf7   : > { %v967_v37 = vadd.f32 %v4219_v61, %v966_v36  ;;  %v1453_v38 = vmax.f32 %v975_v33, 0.0 }
  0xf8   : > { %v3531_v39 = vpop.f32.mrf.mxu0  ;;  %3626 = vmatmul.mubr.msk.bf16.gmra.mxu0 %vm697_vm2, %v3910_v31 }
  0xf9   : > { %v1451_v41 = vmax.f32 %v967_v37, 0.0  ;;  %3629 = vmatprep.mubr.msk.bf16.mxu0 %vm697_vm2, %v3911_v34  ;;  %v1575_v45 = vpack.c.bf16 %v1453_v38, %v1452_v42  ;;  %v988_v51 = vadd.f32 %v3531_v39, %v4219_v61 }
  0xfa   : > { %v979_v43 = vpop.f32.mrf.mxu0 }
  0xfb   : > { %v1574_v44 = vpack.c.bf16 %v1451_v41, %v1450_v40  ;;  %v980_v48 = vadd.f32 %v4219_v61, %v979_v43  ;;  %v1456_v58 = vmax.f32 %v988_v51, 0.0 }
  0xfc   : > { %v3532_v46 = vpop.f32.mrf.mxu0 }
  0xfd   : > { %v991_v49 = vadd.f32 %v3532_v46, %v4219_v61  ;;  %3657 = vmatprep.mubr.msk.bf16.mxu1 %vm1659_vm3, %v1574_v44  ;;  %v1454_v56 = vmax.f32 %v980_v48, 0.0 }
  0xfe   : > { %v982_v52 = vpop.f32.mrf.mxu0  ;;  %3658 = vmatmul.mubr.msk.bf16.gmra.mxu1 %vm1659_vm3, %v1575_v45 }
  0xff   : > { %v983_v53 = vadd.f32 %v4219_v61, %v982_v52  ;;  %v1457_v54 = vmax.f32 %v991_v49, 0.0 }
 0x100   : > { %v3535_v55 = vpop.f32.mrf.mxu0  ;;  %3630 = vmatmul.mubr.msk.bf16.gmra.mxu0 %vm697_vm2, %v3912_v47 }
 0x101   : > { %v1455_v57 = vmax.f32 %v983_v53, 0.0  ;;  %3633 = vmatprep.mubr.msk.bf16.mxu0 %vm697_vm2, %v3913_v50  ;;  %v1577_v62 = vpack.c.bf16 %v1457_v54, %v1456_v58  ;;  %v1004_v4 = vadd.f32 %v3535_v55, %v4219_v61 }
 0x102   : > { %v995_v59 = vpop.f32.mrf.mxu0 }
 0x103   : > { %v1576_v60 = vpack.c.bf16 %v1455_v57, %v1454_v56  ;;  %v996_v1 = vadd.f32 %v4219_v61, %v995_v59  ;;  %v1460_v11 = vmax.f32 %v1004_v4, 0.0 }
 0x104   : > { %v3536_v63 = vpop.f32.mrf.mxu0 }
 0x105   : > { %v1007_v2 = vadd.f32 %v3536_v63, %v4219_v61  ;;  %3661 = vmatprep.mubr.msk.bf16.mxu1 %vm1659_vm3, %v1576_v60  ;;  %v1458_v9 = vmax.f32 %v996_v1, 0.0 }
 0x106   : > { %v998_v5 = vpop.f32.mrf.mxu0  ;;  %3662 = vmatmul.mubr.msk.bf16.gmra.mxu1 %vm1659_vm3, %v1577_v62 }
 0x107   : > { %v999_v6 = vadd.f32 %v4219_v61, %v998_v5  ;;  %v1461_v7 = vmax.f32 %v1007_v2, 0.0 }
 0x108   : > { %v3539_v8 = vpop.f32.mrf.mxu0  ;;  %3634 = vmatmul.mubr.msk.bf16.gmra.mxu0 %vm697_vm2, %v3914_v0 }
 0x109   : > { %v1459_v10 = vmax.f32 %v999_v6, 0.0  ;;  %3637 = vmatprep.mubr.msk.bf16.mxu0 %vm697_vm2, %v3915_v3  ;;  %v1579_v14 = vpack.c.bf16 %v1461_v7, %v1460_v11  ;;  %v1020_v20 = vadd.f32 %v3539_v8, %v4219_v61 }
 0x10a   : > { %v1011_v12 = vpop.f32.mrf.mxu0 }
 0x10b   : > { %v1578_v13 = vpack.c.bf16 %v1459_v10, %v1458_v9  ;;  %v1012_v17 = vadd.f32 %v4219_v61, %v1011_v12  ;;  %v1464_v27 = vmax.f32 %v1020_v20, 0.0 }
 0x10c   : > { %v3540_v15 = vpop.f32.mrf.mxu0 }
 0x10d   : > { %v1023_v18 = vadd.f32 %v3540_v15, %v4219_v61  ;;  %3665 = vmatprep.mubr.msk.bf16.mxu1 %vm1659_vm3, %v1578_v13  ;;  %v1462_v25 = vmax.f32 %v1012_v17, 0.0 }
 0x10e   : > { %v1014_v21 = vpop.f32.mrf.mxu0  ;;  %3666 = vmatmul.mubr.msk.bf16.gmra.mxu1 %vm1659_vm3, %v1579_v14 }
 0x10f   : > { %v1015_v22 = vadd.f32 %v4219_v61, %v1014_v21  ;;  %v1465_v23 = vmax.f32 %v1023_v18, 0.0 }
 0x110   : > { %v3543_v24 = vpop.f32.mrf.mxu0  ;;  %3638 = vmatmul.mubr.msk.bf16.gmra.mxu0 %vm697_vm2, %v3916_v16 }
 0x111   : > { %v1463_v26 = vmax.f32 %v1015_v22, 0.0  ;;  %3641 = vmatprep.mubr.msk.bf16.mxu0 %vm697_vm2, %v3917_v19  ;;  %v1581_v30 = vpack.c.bf16 %v1465_v23, %v1464_v27  ;;  %v1036_v35 = vadd.f32 %v3543_v24, %v4219_v61 }
 0x112   : > { %v1027_v28 = vpop.f32.mrf.mxu0 }
 0x113   : > { %v1580_v29 = vpack.c.bf16 %v1463_v26, %v1462_v25  ;;  %v1028_v33 = vadd.f32 %v4219_v61, %v1027_v28  ;;  %v1468_v42 = vmax.f32 %v1036_v35, 0.0 }
 0x114   : > { %v3544_v31 = vpop.f32.mrf.mxu0 }
 0x115   : > { %v1039_v34 = vadd.f32 %v3544_v31, %v4219_v61  ;;  %3669 = vmatprep.mubr.msk.bf16.mxu1 %vm1659_vm3, %v1580_v29  ;;  %v1466_v40 = vmax.f32 %v1028_v33, 0.0 }
 0x116   : > { %v1030_v36 = vpop.f32.mrf.mxu0  ;;  %3670 = vmatmul.mubr.msk.bf16.gmra.mxu1 %vm1659_vm3, %v1581_v30 }
 0x117   : > { %v1031_v37 = vadd.f32 %v4219_v61, %v1030_v36  ;;  %v1469_v38 = vmax.f32 %v1039_v34, 0.0 }
 0x118   : > { %v3547_v39 = vpop.f32.mrf.mxu0  ;;  %3642 = vmatmul.mubr.msk.bf16.gmra.mxu0 %vm697_vm2, %v3918_v32 }
 0x119   : > { %v1467_v41 = vmax.f32 %v1031_v37, 0.0  ;;  %v1583_v45 = vpack.c.bf16 %v1469_v38, %v1468_v42  ;;  %v1052_v49 = vadd.f32 %v3547_v39, %v4219_v61 }
 0x11a   : > { %v1043_v43 = vpop.f32.mrf.mxu0 }
 0x11b   : > { %v1582_v44 = vpack.c.bf16 %v1467_v41, %v1466_v40  ;;  %v1044_v47 = vadd.f32 %v4219_v61, %v1043_v43  ;;  %v1472_v56 = vmax.f32 %v1052_v49, 0.0 }
 0x11c   : > { %v3548_v46 = vpop.f32.mrf.mxu0 }
 0x11d   : > { %v1055_v48 = vadd.f32 %v3548_v46, %v4219_v61  ;;  %3673 = vmatprep.mubr.msk.bf16.mxu1 %vm1659_vm3, %v1582_v44  ;;  %v1470_v54 = vmax.f32 %v1044_v47, 0.0 }
 0x11e   : > { %v1046_v50 = vpop.f32.mrf.mxu0  ;;  %3674 = vmatmul.mubr.msk.bf16.gmra.mxu1 %vm1659_vm3, %v1583_v45 }
 0x11f   : > { %v1047_v51 = vadd.f32 %v4219_v61, %v1046_v50  ;;  %v1473_v52 = vmax.f32 %v1055_v48, 0.0 }
 0x120   : > { %v3551_v53 = vpop.f32.mrf.mxu0 }
 0x121   : > { %v1471_v55 = vmax.f32 %v1047_v51, 0.0  ;;  %v1585_v59 = vpack.c.bf16 %v1473_v52, %v1472_v56  ;;  %v1068_v0 = vadd.f32 %v3551_v53, %v4219_v61 }
 0x122   : > { %v1059_v57 = vpop.f32.mrf.mxu0 }
 0x123   : > { %v1584_v58 = vpack.c.bf16 %v1471_v55, %v1470_v54  ;;  %v1060_v62 = vadd.f32 %v4219_v61, %v1059_v57  ;;  %v1476_v7 = vmax.f32 %v1068_v0, 0.0 }
 0x124   : > { %v3552_v60 = vpop.f32.mrf.mxu0 }
 0x125   : > { %v1071_v63 = vadd.f32 %v3552_v60, %v4219_v61  ;;  %3677 = vmatprep.mubr.msk.bf16.mxu1 %vm1659_vm3, %v1584_v58  ;;  %v1474_v5 = vmax.f32 %v1060_v62, 0.0 }
 0x126   : > { %v1062_v1 = vpop.f32.mrf.mxu0  ;;  %3678 = vmatmul.mubr.msk.bf16.gmra.mxu1 %vm1659_vm3, %v1585_v59 }
 0x127   : > { %v1063_v2 = vadd.f32 %v4219_v61, %v1062_v1  ;;  %v1477_v3 = vmax.f32 %v1071_v63, 0.0 }
 0x128   : > { %v3555_v4 = vpop.f32.mrf.mxu0 }
 0x129   : > { %v1475_v6 = vmax.f32 %v1063_v2, 0.0  ;;  %v1587_v10 = vpack.c.bf16 %v1477_v3, %v1476_v7  ;;  %v1084_v14 = vadd.f32 %v3555_v4, %v4219_v61 }
 0x12a   : > { %v1075_v8 = vpop.f32.mrf.mxu0 }
 0x12b   : > { %v1586_v9 = vpack.c.bf16 %v1475_v6, %v1474_v5  ;;  %v1076_v12 = vadd.f32 %v4219_v61, %v1075_v8  ;;  %v1480_v21 = vmax.f32 %v1084_v14, 0.0 }
 0x12c   : > { %v3556_v11 = vpop.f32.mrf.mxu0 }
 0x12d   : > { %v1087_v13 = vadd.f32 %v3556_v11, %v4219_v61  ;;  %3681 = vmatprep.mubr.msk.bf16.mxu1 %vm1659_vm3, %v1586_v9  ;;  %v1478_v19 = vmax.f32 %v1076_v12, 0.0 }
 0x12e   : > { %v1078_v15 = vpop.f32.mrf.mxu0  ;;  %3682 = vmatmul.mubr.msk.bf16.gmra.mxu1 %vm1659_vm3, %v1587_v10 }
 0x12f   : > { %v1079_v16 = vadd.f32 %v4219_v61, %v1078_v15  ;;  %v1481_v17 = vmax.f32 %v1087_v13, 0.0 }
 0x130   : > { %v3559_v18 = vpop.f32.mrf.mxu0 }
 0x131   : > { %v1479_v20 = vmax.f32 %v1079_v16, 0.0  ;;  %v1589_v24 = vpack.c.bf16 %v1481_v17, %v1480_v21  ;;  %v1100_v28 = vadd.f32 %v3559_v18, %v4219_v61 }
 0x132   : > { %v1091_v22 = vpop.f32.mrf.mxu0 }
 0x133   : > { %v1588_v23 = vpack.c.bf16 %v1479_v20, %v1478_v19  ;;  %v1092_v26 = vadd.f32 %v4219_v61, %v1091_v22  ;;  %v1484_v35 = vmax.f32 %v1100_v28, 0.0 }
 0x134   : > { %v3560_v25 = vpop.f32.mrf.mxu0 }
 0x135   : > { %v1103_v27 = vadd.f32 %v3560_v25, %v4219_v61  ;;  %3685 = vmatprep.mubr.msk.bf16.mxu1 %vm1659_vm3, %v1588_v23  ;;  %v1482_v33 = vmax.f32 %v1092_v26, 0.0 }
 0x136   : > { %v1094_v29 = vpop.f32.mrf.mxu0  ;;  %3686 = vmatmul.mubr.msk.bf16.gmra.mxu1 %vm1659_vm3, %v1589_v24 }
 0x137   : > { %v1095_v30 = vadd.f32 %v4219_v61, %v1094_v29  ;;  %v1485_v31 = vmax.f32 %v1103_v27, 0.0 }
 0x138   : > { %v3563_v32 = vpop.f32.mrf.mxu0 }
 0x139   : > { %v1483_v34 = vmax.f32 %v1095_v30, 0.0  ;;  %v1591_v38 = vpack.c.bf16 %v1485_v31, %v1484_v35  ;;  %v1116_v42 = vadd.f32 %v3563_v32, %v4219_v61 }
 0x13a   : > { %v1107_v36 = vpop.f32.mrf.mxu0 }
 0x13b   : > { %v1590_v37 = vpack.c.bf16 %v1483_v34, %v1482_v33  ;;  %v1108_v40 = vadd.f32 %v4219_v61, %v1107_v36  ;;  %v1488_v49 = vmax.f32 %v1116_v42, 0.0 }
 0x13c   : > { %v3564_v39 = vpop.f32.mrf.mxu0 }
 0x13d   : > { %v1119_v41 = vadd.f32 %v3564_v39, %v4219_v61  ;;  %3689 = vmatprep.mubr.msk.bf16.mxu1 %vm1659_vm3, %v1590_v37  ;;  %v1486_v47 = vmax.f32 %v1108_v40, 0.0 }
 0x13e   : > { %v1110_v43 = vpop.f32.mrf.mxu0  ;;  %3690 = vmatmul.mubr.msk.bf16.gmra.mxu1 %vm1659_vm3, %v1591_v38 }
 0x13f   : > { %v1111_v44 = vadd.f32 %v4219_v61, %v1110_v43  ;;  %v1489_v45 = vmax.f32 %v1119_v41, 0.0 }
 0x140   : > { %v3567_v46 = vpop.f32.mrf.mxu0 }
 0x141   : > { %v1487_v48 = vmax.f32 %v1111_v44, 0.0  ;;  %v1593_v52 = vpack.c.bf16 %v1489_v45, %v1488_v49  ;;  %v1132_v56 = vadd.f32 %v3567_v46, %v4219_v61 }
 0x142   : > { %v1123_v50 = vpop.f32.mrf.mxu0 }
 0x143   : > { %v1592_v51 = vpack.c.bf16 %v1487_v48, %v1486_v47  ;;  %v1124_v54 = vadd.f32 %v4219_v61, %v1123_v50  ;;  %v1492_v0 = vmax.f32 %v1132_v56, 0.0 }
 0x144   : > { %v3568_v53 = vpop.f32.mrf.mxu0 }
 0x145   : > { %v1135_v55 = vadd.f32 %v3568_v53, %v4219_v61  ;;  %3693 = vmatprep.mubr.msk.bf16.mxu1 %vm1659_vm3, %v1592_v51  ;;  %v1490_v62 = vmax.f32 %v1124_v54, 0.0 }
 0x146   : > { %v1126_v57 = vpop.f32.mrf.mxu0  ;;  %3694 = vmatmul.mubr.msk.bf16.gmra.mxu1 %vm1659_vm3, %v1593_v52 }
 0x147   : > { %v1127_v58 = vadd.f32 %v4219_v61, %v1126_v57  ;;  %v1493_v59 = vmax.f32 %v1135_v55, 0.0 }
 0x148   : > { %v3571_v60 = vpop.f32.mrf.mxu0 }
 0x149   : > { %v1491_v63 = vmax.f32 %v1127_v58, 0.0  ;;  %v1595_v3 = vpack.c.bf16 %v1493_v59, %v1492_v0  ;;  %v1148_v7 = vadd.f32 %v3571_v60, %v4219_v61 }
 0x14a   : > { %v1139_v1 = vpop.f32.mrf.mxu0 }
 0x14b   : > { %v1594_v2 = vpack.c.bf16 %v1491_v63, %v1490_v62  ;;  %v1140_v5 = vadd.f32 %v4219_v61, %v1139_v1  ;;  %v1496_v14 = vmax.f32 %v1148_v7, 0.0 }
 0x14c   : > { %v3572_v4 = vpop.f32.mrf.mxu0 }
 0x14d   : > { %v1151_v6 = vadd.f32 %v3572_v4, %v4219_v61  ;;  %3697 = vmatprep.mubr.msk.bf16.mxu1 %vm1659_vm3, %v1594_v2  ;;  %v1494_v12 = vmax.f32 %v1140_v5, 0.0 }
 0x14e   : > { %v1142_v8 = vpop.f32.mrf.mxu0  ;;  %3698 = vmatmul.mubr.msk.bf16.gmra.mxu1 %vm1659_vm3, %v1595_v3 }
 0x14f   : > { %v1143_v9 = vadd.f32 %v4219_v61, %v1142_v8  ;;  %v1497_v10 = vmax.f32 %v1151_v6, 0.0 }
 0x150   : > { %v3575_v11 = vpop.f32.mrf.mxu0 }
 0x151   : > { %v1495_v13 = vmax.f32 %v1143_v9, 0.0  ;;  %v1597_v17 = vpack.c.bf16 %v1497_v10, %v1496_v14  ;;  %v1164_v21 = vadd.f32 %v3575_v11, %v4219_v61 }
 0x152   : > { %v1155_v15 = vpop.f32.mrf.mxu0 }
 0x153   : > { %v1596_v16 = vpack.c.bf16 %v1495_v13, %v1494_v12  ;;  %v1156_v19 = vadd.f32 %v4219_v61, %v1155_v15  ;;  %v1500_v28 = vmax.f32 %v1164_v21, 0.0 }
 0x154   : > { %v3576_v18 = vpop.f32.mrf.mxu0 }
 0x155   : > { %v1167_v20 = vadd.f32 %v3576_v18, %v4219_v61  ;;  %3701 = vmatprep.mubr.msk.bf16.mxu1 %vm1659_vm3, %v1596_v16  ;;  %v1498_v26 = vmax.f32 %v1156_v19, 0.0 }
 0x156   : > { %v1158_v22 = vpop.f32.mrf.mxu0  ;;  %3702 = vmatmul.mubr.msk.bf16.gmra.mxu1 %vm1659_vm3, %v1597_v17 }
 0x157   : > { %v1159_v23 = vadd.f32 %v4219_v61, %v1158_v22  ;;  %v1501_v24 = vmax.f32 %v1167_v20, 0.0 }
 0x158   : > { %v3579_v25 = vpop.f32.mrf.mxu0 }
 0x159   : > { %v1499_v27 = vmax.f32 %v1159_v23, 0.0  ;;  %v1599_v31 = vpack.c.bf16 %v1501_v24, %v1500_v28  ;;  %v1180_v35 = vadd.f32 %v3579_v25, %v4219_v61 }
 0x15a   : > { %v1171_v29 = vpop.f32.mrf.mxu0 }
 0x15b   : > { %v1598_v30 = vpack.c.bf16 %v1499_v27, %v1498_v26  ;;  %v1172_v33 = vadd.f32 %v4219_v61, %v1171_v29  ;;  %v1504_v42 = vmax.f32 %v1180_v35, 0.0 }
 0x15c   : > { %v3580_v32 = vpop.f32.mrf.mxu0 }
 0x15d   : > { %v1183_v34 = vadd.f32 %v3580_v32, %v4219_v61  ;;  %3705 = vmatprep.mubr.msk.bf16.mxu1 %vm1659_vm3, %v1598_v30  ;;  %v1502_v40 = vmax.f32 %v1172_v33, 0.0 }
 0x15e   : > { %v1174_v36 = vpop.f32.mrf.mxu0  ;;  %3706 = vmatmul.mubr.msk.bf16.gmra.mxu1 %vm1659_vm3, %v1599_v31 }
 0x15f   : > { %v1175_v37 = vadd.f32 %v4219_v61, %v1174_v36  ;;  %v1505_v38 = vmax.f32 %v1183_v34, 0.0 }
 0x160   : > { %v3583_v39 = vpop.f32.mrf.mxu0 }
 0x161   : > { %v1503_v41 = vmax.f32 %v1175_v37, 0.0  ;;  %v1601_v45 = vpack.c.bf16 %v1505_v38, %v1504_v42  ;;  %v1196_v49 = vadd.f32 %v3583_v39, %v4219_v61 }
 0x162   : > { %v1187_v43 = vpop.f32.mrf.mxu0 }
 0x163   : > { %v1600_v44 = vpack.c.bf16 %v1503_v41, %v1502_v40  ;;  %v1188_v47 = vadd.f32 %v4219_v61, %v1187_v43  ;;  %v1508_v56 = vmax.f32 %v1196_v49, 0.0 }
 0x164   : > { %v3584_v46 = vpop.f32.mrf.mxu0 }
 0x165   : > { %3709 = vmatprep.mubr.msk.bf16.mxu1 %vm1659_vm3, %v1600_v44  ;;  %v1199_v48 = vadd.f32 %v3584_v46, %v4219_v61  ;;  %v1506_v54 = vmax.f32 %v1188_v47, 0.0 }
 0x166   : > { %3710 = vmatmul.mubr.msk.bf16.gmra.mxu1 %vm1659_vm3, %v1601_v45  ;;  %v1190_v50 = vpop.f32.mrf.mxu0 }
 0x167   : > { %v1191_v51 = vadd.f32 %v4219_v61, %v1190_v50  ;;  %v1509_v52 = vmax.f32 %v1199_v48, 0.0 }
 0x168   : > { %v3587_v53 = vpop.f32.mrf.mxu0 }
 0x169   : > { %v1507_v55 = vmax.f32 %v1191_v51, 0.0  ;;  %v1603_v59 = vpack.c.bf16 %v1509_v52, %v1508_v56  ;;  %v1212_v0 = vadd.f32 %v3587_v53, %v4219_v61 }
 0x16a   : > { %v1203_v57 = vpop.f32.mrf.mxu0 }
 0x16b   : > { %v1602_v58 = vpack.c.bf16 %v1507_v55, %v1506_v54  ;;  %v1204_v62 = vadd.f32 %v4219_v61, %v1203_v57  ;;  %v1512_v7 = vmax.f32 %v1212_v0, 0.0 }
 0x16c   : > { %v3588_v60 = vpop.f32.mrf.mxu0 }
 0x16d   : > { %v1215_v63 = vadd.f32 %v3588_v60, %v4219_v61  ;;  %3713 = vmatprep.mubr.msk.bf16.mxu1 %vm1659_vm3, %v1602_v58  ;;  %v1510_v5 = vmax.f32 %v1204_v62, 0.0 }
 0x16e   : > { %v1206_v1 = vpop.f32.mrf.mxu0  ;;  %3714 = vmatmul.mubr.msk.bf16.gmra.mxu1 %vm1659_vm3, %v1603_v59 }
 0x16f   : > { %v1207_v2 = vadd.f32 %v4219_v61, %v1206_v1  ;;  %v1513_v3 = vmax.f32 %v1215_v63, 0.0 }
 0x170   : > { %v3591_v4 = vpop.f32.mrf.mxu0 }
 0x171   : > { %v1511_v6 = vmax.f32 %v1207_v2, 0.0  ;;  %v1605_v10 = vpack.c.bf16 %v1513_v3, %v1512_v7  ;;  %v1228_v14 = vadd.f32 %v3591_v4, %v4219_v61 }
 0x172   : > { %v1219_v8 = vpop.f32.mrf.mxu0 }
 0x173   : > { %v1604_v9 = vpack.c.bf16 %v1511_v6, %v1510_v5  ;;  %v1220_v12 = vadd.f32 %v4219_v61, %v1219_v8  ;;  %v1516_v21 = vmax.f32 %v1228_v14, 0.0 }
 0x174   : > { %v3592_v11 = vpop.f32.mrf.mxu0 }
 0x175   : > { %v1231_v13 = vadd.f32 %v3592_v11, %v4219_v61  ;;  %3717 = vmatprep.mubr.msk.bf16.mxu1 %vm1659_vm3, %v1604_v9  ;;  %v1514_v19 = vmax.f32 %v1220_v12, 0.0 }
 0x176   : > { %v1222_v15 = vpop.f32.mrf.mxu0  ;;  %3718 = vmatmul.mubr.msk.bf16.gmra.mxu1 %vm1659_vm3, %v1605_v10 }
 0x177   : > { %v1223_v16 = vadd.f32 %v4219_v61, %v1222_v15  ;;  %v1517_v17 = vmax.f32 %v1231_v13, 0.0 }
 0x178   : > { %v3595_v18 = vpop.f32.mrf.mxu0 }
 0x179   : > { %v1515_v20 = vmax.f32 %v1223_v16, 0.0  ;;  %v1607_v24 = vpack.c.bf16 %v1517_v17, %v1516_v21  ;;  %v1244_v28 = vadd.f32 %v3595_v18, %v4219_v61 }
 0x17a   : > { %v1235_v22 = vpop.f32.mrf.mxu0 }
 0x17b   : > { %v1606_v23 = vpack.c.bf16 %v1515_v20, %v1514_v19  ;;  %v1236_v26 = vadd.f32 %v4219_v61, %v1235_v22  ;;  %v1520_v35 = vmax.f32 %v1244_v28, 0.0 }
 0x17c   : > { %v3596_v25 = vpop.f32.mrf.mxu0 }
 0x17d   : > { %v1247_v27 = vadd.f32 %v3596_v25, %v4219_v61  ;;  %3721 = vmatprep.mubr.msk.bf16.mxu1 %vm1659_vm3, %v1606_v23  ;;  %v1518_v33 = vmax.f32 %v1236_v26, 0.0 }
 0x17e   : > { %v1238_v29 = vpop.f32.mrf.mxu0  ;;  %3722 = vmatmul.mubr.msk.bf16.gmra.mxu1 %vm1659_vm3, %v1607_v24 }
 0x17f   : > { %v1239_v30 = vadd.f32 %v4219_v61, %v1238_v29  ;;  %v1521_v31 = vmax.f32 %v1247_v27, 0.0 }
 0x180   : > { %v3599_v32 = vpop.f32.mrf.mxu0 }
 0x181   : > { %v1519_v34 = vmax.f32 %v1239_v30, 0.0  ;;  %v1609_v38 = vpack.c.bf16 %v1521_v31, %v1520_v35  ;;  %v1260_v42 = vadd.f32 %v3599_v32, %v4219_v61 }
 0x182   : > { %v1251_v36 = vpop.f32.mrf.mxu0 }
 0x183   : > { %v1608_v37 = vpack.c.bf16 %v1519_v34, %v1518_v33  ;;  %v1252_v40 = vadd.f32 %v4219_v61, %v1251_v36  ;;  %v1524_v49 = vmax.f32 %v1260_v42, 0.0 }
 0x184   : > { %v3600_v39 = vpop.f32.mrf.mxu0 }
 0x185   : > { %v1263_v41 = vadd.f32 %v3600_v39, %v4219_v61  ;;  %3725 = vmatprep.mubr.msk.bf16.mxu1 %vm1659_vm3, %v1608_v37  ;;  %v1522_v47 = vmax.f32 %v1252_v40, 0.0 }
 0x186   : > { %v1254_v43 = vpop.f32.mrf.mxu0  ;;  %3726 = vmatmul.mubr.msk.bf16.gmra.mxu1 %vm1659_vm3, %v1609_v38 }
 0x187   : > { %v1255_v44 = vadd.f32 %v4219_v61, %v1254_v43  ;;  %v1525_v45 = vmax.f32 %v1263_v41, 0.0 }
 0x188   : > { %v3603_v46 = vpop.f32.mrf.mxu0 }
 0x189   : > { %v1523_v48 = vmax.f32 %v1255_v44, 0.0  ;;  %v1611_v52 = vpack.c.bf16 %v1525_v45, %v1524_v49  ;;  %v1276_v56 = vadd.f32 %v3603_v46, %v4219_v61 }
 0x18a   : > { %v1267_v50 = vpop.f32.mrf.mxu0 }
 0x18b   : > { %v1610_v51 = vpack.c.bf16 %v1523_v48, %v1522_v47  ;;  %v1268_v54 = vadd.f32 %v4219_v61, %v1267_v50  ;;  %v1528_v0 = vmax.f32 %v1276_v56, 0.0 }
 0x18c   : > { %v3604_v53 = vpop.f32.mrf.mxu0 }
 0x18d   : > { %v1279_v55 = vadd.f32 %v3604_v53, %v4219_v61  ;;  %3729 = vmatprep.mubr.msk.bf16.mxu1 %vm1659_vm3, %v1610_v51  ;;  %v1526_v62 = vmax.f32 %v1268_v54, 0.0  ;;  %v4402_v51 = vld [vmem:[%s4919_s2 + $0x1] ss:$0 sm:$0xff] }
 0x18e   : > { %v1270_v57 = vpop.f32.mrf.mxu0  ;;  %3730 = vmatmul.mubr.msk.bf16.gmra.mxu1 %vm1659_vm3, %v1611_v52 }
 0x18f   : > { %v1271_v58 = vadd.f32 %v4219_v61, %v1270_v57  ;;  %v1529_v59 = vmax.f32 %v1279_v55, 0.0 }
 0x190   : > { %v3607_v60 = vpop.f32.mrf.mxu0 }
 0x191   : > { %v1527_v63 = vmax.f32 %v1271_v58, 0.0  ;;  %v1613_v3 = vpack.c.bf16 %v1529_v59, %v1528_v0  ;;  %v1292_v7 = vadd.f32 %v3607_v60, %v4219_v61 }
 0x192   : > { %v1283_v1 = vpop.f32.mrf.mxu0 }
 0x193   : > { %v1612_v2 = vpack.c.bf16 %v1527_v63, %v1526_v62  ;;  %v1284_v5 = vadd.f32 %v4219_v61, %v1283_v1  ;;  %v1532_v14 = vmax.f32 %v1292_v7, 0.0 }
 0x194   : > { %v3608_v4 = vpop.f32.mrf.mxu0 }
 0x195   : > { %v1295_v6 = vadd.f32 %v3608_v4, %v4219_v61  ;;  %3733 = vmatprep.mubr.msk.bf16.mxu1 %vm1659_vm3, %v1612_v2  ;;  %v1530_v12 = vmax.f32 %v1284_v5, 0.0 }
 0x196   : > { %v1286_v8 = vpop.f32.mrf.mxu0  ;;  %3734 = vmatmul.mubr.msk.bf16.gmra.mxu1 %vm1659_vm3, %v1613_v3 }
 0x197   : > { %v1287_v9 = vadd.f32 %v4219_v61, %v1286_v8  ;;  %v1533_v10 = vmax.f32 %v1295_v6, 0.0 }
 0x198   : > { %v3611_v11 = vpop.f32.mrf.mxu0 }
 0x199   : > { %v1531_v13 = vmax.f32 %v1287_v9, 0.0  ;;  %v1615_v17 = vpack.c.bf16 %v1533_v10, %v1532_v14  ;;  %v1308_v21 = vadd.f32 %v3611_v11, %v4219_v61 }
 0x19a   : > { %v1299_v15 = vpop.f32.mrf.mxu0 }
 0x19b   : > { %v1614_v16 = vpack.c.bf16 %v1531_v13, %v1530_v12  ;;  %v1300_v19 = vadd.f32 %v4219_v61, %v1299_v15  ;;  %v1536_v28 = vmax.f32 %v1308_v21, 0.0 }
 0x19c   : > { %v3612_v18 = vpop.f32.mrf.mxu0 }
 0x19d   : > { %v1311_v20 = vadd.f32 %v3612_v18, %v4219_v61  ;;  %3737 = vmatprep.mubr.msk.bf16.mxu1 %vm1659_vm3, %v1614_v16  ;;  %v1534_v26 = vmax.f32 %v1300_v19, 0.0 }
 0x19e   : > { %v1302_v22 = vpop.f32.mrf.mxu0  ;;  %3738 = vmatmul.mubr.msk.bf16.gmra.mxu1 %vm1659_vm3, %v1615_v17 }
 0x19f   : > { %v1303_v23 = vadd.f32 %v4219_v61, %v1302_v22  ;;  %v1537_v24 = vmax.f32 %v1311_v20, 0.0 }
 0x1a0   : > { %v3615_v25 = vpop.f32.mrf.mxu0 }
 0x1a1   : > { %v1535_v27 = vmax.f32 %v1303_v23, 0.0  ;;  %v1617_v31 = vpack.c.bf16 %v1537_v24, %v1536_v28  ;;  %v1324_v35 = vadd.f32 %v3615_v25, %v4219_v61 }
 0x1a2   : > { %v1315_v29 = vpop.f32.mrf.mxu0 }
 0x1a3   : > { %v1616_v30 = vpack.c.bf16 %v1535_v27, %v1534_v26  ;;  %v1316_v33 = vadd.f32 %v4219_v61, %v1315_v29  ;;  %v1540_v42 = vmax.f32 %v1324_v35, 0.0 }
 0x1a4   : > { %v3616_v32 = vpop.f32.mrf.mxu0 }
 0x1a5   : > { %v1327_v34 = vadd.f32 %v3616_v32, %v4219_v61  ;;  %3741 = vmatprep.mubr.msk.bf16.mxu1 %vm1659_vm3, %v1616_v30  ;;  %v1538_v40 = vmax.f32 %v1316_v33, 0.0 }
 0x1a6   : > { %v1318_v36 = vpop.f32.mrf.mxu0  ;;  %3742 = vmatmul.mubr.msk.bf16.gmra.mxu1 %vm1659_vm3, %v1617_v31 }
 0x1a7   : > { %v1319_v37 = vadd.f32 %v4219_v61, %v1318_v36  ;;  %v1541_v38 = vmax.f32 %v1327_v34, 0.0 }
 0x1a8   : > { %v3619_v39 = vpop.f32.mrf.mxu0 }
 0x1a9   : > { %v1539_v41 = vmax.f32 %v1319_v37, 0.0  ;;  %v1619_v45 = vpack.c.bf16 %v1541_v38, %v1540_v42  ;;  %v1340_v49 = vadd.f32 %v3619_v39, %v4219_v61 }
 0x1aa   : > { %v1331_v43 = vpop.f32.mrf.mxu0 }
 0x1ab   : > { %v1618_v44 = vpack.c.bf16 %v1539_v41, %v1538_v40  ;;  %v1332_v47 = vadd.f32 %v4219_v61, %v1331_v43  ;;  %v1544_v60 = vmax.f32 %v1340_v49, 0.0 }
 0x1ac   : > { %v3620_v46 = vpop.f32.mrf.mxu0 }
 0x1ad   : > { %v1343_v48 = vadd.f32 %v3620_v46, %v4219_v61  ;;  %3745 = vmatprep.mubr.msk.bf16.mxu1 %vm1659_vm3, %v1618_v44  ;;  %v1542_v58 = vmax.f32 %v1332_v47, 0.0 }
 0x1ae   : > { %v3651_v50 = vpop.f32.mrf.mxu1  ;;  %v1334_v52 = vpop.f32.mrf.mxu0  ;;  %3746 = vmatmul.mubr.msk.bf16.gmra.mxu1 %vm1659_vm3, %v1619_v45 }
 0x1af   : > { %v1335_v53 = vadd.f32 %v4219_v61, %v1334_v52  ;;  %v1545_v55 = vmax.f32 %v1343_v48, 0.0  ;;  %v1895_v57 = vadd.f32 %v3651_v50, %v4402_v51 }
 0x1b0   : > { %v1886_v54 = vpop.f32.mrf.mxu1  ;;  %v3623_v56 = vpop.f32.mrf.mxu0 }
 0x1b1   : > { %v1543_v59 = vmax.f32 %v1335_v53, 0.0  ;;  %v1887_v0 = vadd.f32 %v4402_v51, %v1886_v54  ;;  %v1621_v3 = vpack.c.bf16 %v1545_v55, %v1544_v60  ;;  %v2399_v6 = vmax.f32 %v1895_v57, 0.0 }
 0x1b2   : > { %v3652_v62 = vpop.f32.mrf.mxu1  ;;  %v1347_v63 = vpop.f32.mrf.mxu0  ;;  %v1356_v16 = vadd.f32 %v3623_v56, %v4219_v61 }
 0x1b3   : > { %v1898_v1 = vadd.f32 %v3652_v62, %v4402_v51  ;;  %v1620_v2 = vpack.c.bf16 %v1543_v59, %v1542_v58  ;;  %v1348_v11 = vadd.f32 %v4219_v61, %v1347_v63  ;;  %v2397_v13 = vmax.f32 %v1887_v0, 0.0 }
 0x1b4   : > { %v1889_v4 = vpop.f32.mrf.mxu1  ;;  %v3624_v5 = vpop.f32.mrf.mxu0  ;;  %v1548_v27 = vmax.f32 %v1356_v16, 0.0 }
 0x1b5   : > { %v2400_v7 = vmax.f32 %v1898_v1, 0.0  ;;  %v1890_v8 = vadd.f32 %v4402_v51, %v1889_v4  ;;  %v1359_v9 = vadd.f32 %v3624_v5, %v4219_v61  ;;  %3749 = vmatprep.mubr.msk.bf16.mxu1 %vm1659_vm3, %v1620_v2  ;;  %v1546_v23 = vmax.f32 %v1348_v11, 0.0  ;;  %v4450_v1 = vld [vmem:[%s4919_s2] ss:$0 sm:$0xff] }
 0x1b6   : > { %v3655_v10 = vpop.f32.mrf.mxu1  ;;  %v1350_v12 = vpop.f32.mrf.mxu0  ;;  %3750 = vmatmul.mubr.msk.bf16.gmra.mxu1 %vm1659_vm3, %v1621_v3 }
 0x1b7   : > { %v4414_v14 = vpack.c.bf16 %v2400_v7, %v2399_v6  ;;  %v2398_v15 = vmax.f32 %v1890_v8, 0.0  ;;  %v1911_v17 = vadd.f32 %v3655_v10, %v4402_v51  ;;  %v1351_v19 = vadd.f32 %v4219_v61, %v1350_v12 }
 0x1b8   : > { %v1902_v18 = vpop.f32.mrf.mxu1  ;;  %v3627_v20 = vpop.f32.mrf.mxu0  ;;  %v1549_v22 = vmax.f32 %v1359_v9, 0.0 }
 0x1b9   : > { %v4419_v21 = vpack.c.bf16 %v2398_v15, %v2397_v13  ;;  %v1547_v25 = vmax.f32 %v1351_v19, 0.0  ;;  %v1903_v28 = vadd.f32 %v4402_v51, %v1902_v18  ;;  %v2403_v30 = vmax.f32 %v1911_v17, 0.0 }
 0x1ba   : > { %v3656_v24 = vpop.f32.mrf.mxu1  ;;  %v1363_v26 = vpop.f32.mrf.mxu0  ;;  %v1623_v34 = vpack.c.bf16 %v1549_v22, %v1548_v27  ;;  %v1372_v44 = vadd.f32 %v3627_v20, %v4219_v61 }
 0x1bb   : > { %v1914_v29 = vadd.f32 %v3656_v24, %v4402_v51  ;;  %v1622_v31 = vpack.c.bf16 %v1547_v25, %v1546_v23  ;;  %v1364_v39 = vadd.f32 %v4219_v61, %v1363_v26  ;;  %v2401_v41 = vmax.f32 %v1903_v28, 0.0 }
 0x1bc   : > { %v1905_v32 = vpop.f32.mrf.mxu1  ;;  %v3628_v33 = vpop.f32.mrf.mxu0  ;;  %v1552_v55 = vmax.f32 %v1372_v44, 0.0 }
 0x1bd   : > { %v2404_v35 = vmax.f32 %v1914_v29, 0.0  ;;  %v1906_v36 = vadd.f32 %v4402_v51, %v1905_v32  ;;  %v1375_v37 = vadd.f32 %v3628_v33, %v4219_v61  ;;  %3753 = vmatprep.mubr.msk.bf16.mxu1 %vm1659_vm3, %v1622_v31  ;;  %v1550_v50 = vmax.f32 %v1364_v39, 0.0 }
 0x1be   : > { %v4425_v38 = vpop.f32.mrf.mxu1  ;;  %v1366_v40 = vpop.f32.mrf.mxu0  ;;  %3754 = vmatmul.mubr.msk.bf16.gmra.mxu1 %vm1659_vm3, %v1623_v34 }
 0x1bf   : > { %v4429_v42 = vpack.c.bf16 %v2404_v35, %v2403_v30  ;;  %v2402_v43 = vmax.f32 %v1906_v36, 0.0  ;;  %v1367_v46 = vadd.f32 %v4219_v61, %v1366_v40  ;;  %v1553_v49 = vmax.f32 %v1375_v37, 0.0 }
 0x1c0   : > { %v4433_v45 = vpop.f32.mrf.mxu1  ;;  %v3631_v47 = vpop.f32.mrf.mxu0 }
 0x1c1   : > { %v4436_v48 = vpack.c.bf16 %v2402_v43, %v2401_v41  ;;  %v1551_v53 = vmax.f32 %v1367_v46, 0.0  ;;  %v1625_v59 = vpack.c.bf16 %v1553_v49, %v1552_v55  ;;  %v1388_v2 = vadd.f32 %v4450_v1, %v3631_v47 }
 0x1c2   : > { %v4438_v52 = vpop.f32.mrf.mxu1  ;;  %v1379_v54 = vpop.f32.mrf.mxu0 }
 0x1c3   : > { %v1624_v56 = vpack.c.bf16 %v1551_v53, %v1550_v50  ;;  %v1380_v63 = vadd.f32 %v4219_v61, %v1379_v54  ;;  %v1556_v10 = vmax.f32 %v1388_v2, 0.0 }
 0x1c4   : > { %v4440_v57 = vpop.f32.mrf.mxu1  ;;  %v3632_v58 = vpop.f32.mrf.mxu0 }
 0x1c5   : > { %v1391_v60 = vadd.f32 %v3632_v58, %v4219_v61  ;;  %3757 = vmatprep.mubr.msk.bf16.mxu1 %vm1659_vm3, %v1624_v56  ;;  %v1554_v7 = vmax.f32 %v1380_v63, 0.0 }
 0x1c6   : > { %v4443_v62 = vpop.f32.mrf.mxu1  ;;  %v1382_v0 = vpop.f32.mrf.mxu0  ;;  %3758 = vmatmul.mubr.msk.bf16.gmra.mxu1 %vm1659_vm3, %v1625_v59 }
 0x1c7   : > { %v1383_v4 = vadd.f32 %v4450_v1, %v1382_v0  ;;  %v1557_v6 = vmax.f32 %v1391_v60, 0.0 }
 0x1c8   : > { %v4454_v3 = vpop.f32.mrf.mxu1  ;;  %v3635_v5 = vpop.f32.mrf.mxu0 }
 0x1c9   : > { %v1555_v8 = vmax.f32 %v1383_v4, 0.0  ;;  %v1627_v15 = vpack.c.bf16 %v1557_v6, %v1556_v10  ;;  %v1404_v20 = vadd.f32 %v4450_v1, %v3635_v5 }
 0x1ca   : > { %v4457_v61 = vpop.f32.mrf.mxu1  ;;  %v1395_v9 = vpop.f32.mrf.mxu0 }
 0x1cb   : > { %v1626_v11 = vpack.c.bf16 %v1555_v8, %v1554_v7  ;;  %v1396_v18 = vadd.f32 %v4450_v1, %v1395_v9  ;;  %v1560_v31 = vmax.f32 %v1404_v20, 0.0 }
 0x1cc   : > { %v4459_v12 = vpop.f32.mrf.mxu1  ;;  %v3636_v13 = vpop.f32.mrf.mxu0 }
 0x1cd   : > { %v1407_v16 = vadd.f32 %v4450_v1, %v3636_v13  ;;  %3761 = vmatprep.mubr.msk.bf16.mxu1 %vm1659_vm3, %v1626_v11  ;;  %v1558_v27 = vmax.f32 %v1396_v18, 0.0 }
 0x1ce   : > { %v3667_v17 = vpop.f32.mrf.mxu1  ;;  %v1398_v19 = vpop.f32.mrf.mxu0  ;;  %3762 = vmatmul.mubr.msk.bf16.gmra.mxu1 %vm1659_vm3, %v1627_v15 }
 0x1cf   : > { %v1399_v23 = vadd.f32 %v4450_v1, %v1398_v19  ;;  %v1959_v25 = vadd.f32 %v3667_v17, %v4402_v51  ;;  %v1561_v26 = vmax.f32 %v1407_v16, 0.0 }
 0x1d0   : > { %v4466_v22 = vpop.f32.mrf.mxu1  ;;  %v3639_v24 = vpop.f32.mrf.mxu0 }
 0x1d1   : > { %v1559_v29 = vmax.f32 %v1399_v23, 0.0  ;;  %v2415_v36 = vmax.f32 %v1959_v25, 0.0  ;;  %v1629_v37 = vpack.c.bf16 %v1561_v26, %v1560_v31  ;;  %v1420_v47 = vadd.f32 %v4450_v1, %v3639_v24 }
 0x1d2   : > { %v3668_v28 = vpop.f32.mrf.mxu1  ;;  %v1411_v30 = vpop.f32.mrf.mxu0  ;;  %v1946_v23 = vadd.f32 %v4457_v61, %v4402_v51  ;;  %v1943_v26 = vadd.f32 %v4443_v62, %v4402_v51  ;;  %v1938_v61 = vadd.f32 %v4402_v51, %v4459_v12 }
 0x1d3   : > { %v1962_v32 = vadd.f32 %v3668_v28, %v4402_v51  ;;  %v1628_v33 = vpack.c.bf16 %v1559_v29, %v1558_v27  ;;  %v1412_v43 = vadd.f32 %v4450_v1, %v1411_v30  ;;  %v1564_v60 = vmax.f32 %v1420_v47, 0.0 }
 0x1d4   : > { %v4471_v34 = vpop.f32.mrf.mxu1  ;;  %v3640_v35 = vpop.f32.mrf.mxu0  ;;  %v2412_v27 = vmax.f32 %v1946_v23, 0.0  ;;  %v2411_v30 = vmax.f32 %v1943_v26, 0.0 }
 0x1d5   : > { %v2416_v39 = vmax.f32 %v1962_v32, 0.0  ;;  %v1423_v40 = vadd.f32 %v4450_v1, %v3640_v35  ;;  %3765 = vmatprep.mubr.msk.bf16.mxu1 %vm1659_vm3, %v1628_v33  ;;  %v1562_v55 = vmax.f32 %v1412_v43, 0.0 }
 0x1d6   : > { %v4474_v41 = vpop.f32.mrf.mxu1  ;;  %v1414_v44 = vpop.f32.mrf.mxu0  ;;  %3766 = vmatmul.mubr.msk.bf16.gmra.mxu1 %vm1659_vm3, %v1629_v37  ;;  %v2532_v35 = vpack.c.bf16 %v2412_v27, %v2411_v30 }
 0x1d7   : > { %v4478_v46 = vpack.c.bf16 %v2416_v39, %v2415_v36  ;;  %v1415_v50 = vadd.f32 %v4450_v1, %v1414_v44  ;;  %v1565_v54 = vmax.f32 %v1423_v40, 0.0  ;;  %v1935_v39 = vadd.f32 %v4402_v51, %v4454_v3 }
 0x1d8   : > { %v4482_v49 = vpop.f32.mrf.mxu1  ;;  %v3643_v53 = vpop.f32.mrf.mxu0 }
 0x1d9   : > { %v1563_v58 = vmax.f32 %v1415_v50, 0.0  ;;  %v1631_v4 = vpack.c.bf16 %v1565_v54, %v1564_v60  ;;  %v1436_v9 = vadd.f32 %v4450_v1, %v3643_v53  ;;  %v2410_v50 = vmax.f32 %v1938_v61, 0.0 }
 0x1da   : > { %v4485_v56 = vpop.f32.mrf.mxu1  ;;  %v1427_v59 = vpop.f32.mrf.mxu0  ;;  %v2409_v3 = vmax.f32 %v1935_v39, 0.0  ;;  %v1919_v39 = vadd.f32 %v4402_v51, %v4433_v45 }
 0x1db   : > { %v1630_v63 = vpack.c.bf16 %v1563_v58, %v1562_v55  ;;  %v1428_v7 = vadd.f32 %v4450_v1, %v1427_v59  ;;  %v1568_v18 = vmax.f32 %v1436_v9, 0.0  ;;  %v2621_v58 = vsel %vm1659_vm3, %v2532_v35, 0  ;;  %v4518_v59 = vld [vmem:[%s4920_s3] sm:$0xf] }
 0x1dc   : > { %v4487_v0 = vpop.f32.mrf.mxu1  ;;  %v3644_v2 = vpop.f32.mrf.mxu0  ;;  %3457 = vmatprep.mubr.msk.bf16.mxu0 %vm1659_vm3, %v4518_v59  ;;  %v2405_v45 = vmax.f32 %v1919_v39, 0.0 }
 0x1dd   : > { %v1439_v5 = vadd.f32 %v4450_v1, %v3644_v2  ;;  %3769 = vmatprep.mubr.msk.bf16.mxu1 %vm1659_vm3, %v1630_v63  ;;  %v1566_v15 = vmax.f32 %v1428_v7, 0.0  ;;  %v2531_v7 = vpack.c.bf16 %v2410_v50, %v2409_v3  ;;  %v1975_v3 = vadd.f32 %v4474_v41, %v4402_v51 }
 0x1de   : > { %v3675_v6 = vpop.f32.mrf.mxu1  ;;  %v1430_v8 = vpop.f32.mrf.mxu0  ;;  %3770 = vmatmul.mubr.msk.bf16.gmra.mxu1 %vm1659_vm3, %v1631_v4  ;;  %v1967_v41 = vadd.f32 %v4402_v51, %v4482_v49 }
 0x1df   : > { %v1431_v11 = vadd.f32 %v4450_v1, %v1430_v8  ;;  %v1569_v13 = vmax.f32 %v1439_v5, 0.0  ;;  %v1991_v63 = vadd.f32 %v3675_v6, %v4402_v51  ;;  %v1930_v5 = vadd.f32 %v4438_v52, %v4402_v51 }
 0x1e0   : > { %v4494_v10 = vpop.f32.mrf.mxu1  ;;  %v1927_v6 = vadd.f32 %v4425_v38, %v4402_v51  ;;  %v2618_v52 = vsel %vm1659_vm3, %v2531_v7, 0 }
 0x1e1   : > { %v1567_v17 = vmax.f32 %v1431_v11, 0.0  ;;  %v1633_v24 = vpack.c.bf16 %v1569_v13, %v1568_v18  ;;  %v1983_v38 = vadd.f32 %v4402_v51, %v4494_v10 }
 0x1e2   : > { %v3676_v16 = vpop.f32.mrf.mxu1 }
 0x1e3   : > { %v1632_v19 = vpack.c.bf16 %v1567_v17, %v1566_v15  ;;  %v1994_v54 = vadd.f32 %v3676_v16, %v4402_v51  ;;  %v2423_v17 = vmax.f32 %v1991_v63, 0.0 }
 0x1e4   : > { %v1985_v20 = vpop.f32.mrf.mxu1 }
 0x1e5   : > { %3773 = vmatprep.mubr.msk.bf16.mxu1 %vm1659_vm3, %v1632_v19  ;;  %v2424_v9 = vmax.f32 %v1994_v54, 0.0 }
 0x1e6   : > { %v3679_v25 = vpop.f32.mrf.mxu1  ;;  %3774 = vmatmul.mubr.msk.bf16.gmra.mxu1 %vm1659_vm3, %v1633_v24  ;;  %v2408_v24 = vmax.f32 %v1930_v5, 0.0 }
 0x1e7   : > { %v2007_v28 = vadd.f32 %v3679_v25, %v4402_v51  ;;  %3475 = vmatprep.mubr.msk.bf16.mxu1 %vm1659_vm3, %v4518_v59  ;;  %v2538_v26 = vpack.c.bf16 %v2424_v9, %v2423_v17 }
 0x1e8   : > { %v1998_v1 = vpop.f32.mrf.mxu1 }
 0x1e9   : > { %v1999_v31 = vadd.f32 %v4402_v51, %v1998_v1  ;;  %v2427_v36 = vmax.f32 %v2007_v28, 0.0  ;;  %v1986_v1 = vadd.f32 %v4402_v51, %v1985_v20  ;;  %v1922_v20 = vadd.f32 %v4402_v51, %v4440_v57 }
 0x1ea   : > { %v3680_v29 = vpop.f32.mrf.mxu1  ;;  %v1978_v57 = vadd.f32 %v4485_v56, %v4402_v51  ;;  %v2419_v56 = vmax.f32 %v1975_v3, 0.0 }
 0x1eb   : > { %v2010_v32 = vadd.f32 %v3680_v29, %v4402_v51  ;;  %v2425_v43 = vmax.f32 %v1999_v31, 0.0  ;;  %v2407_v29 = vmax.f32 %v1927_v6, 0.0  ;;  %v2422_v35 = vmax.f32 %v1986_v1, 0.0 }
 0x1ec   : > { %v2001_v33 = vpop.f32.mrf.mxu1  ;;  %v2406_v50 = vmax.f32 %v1922_v20, 0.0  ;;  %v2606_v20 = vsel %vm1659_vm3, %v4436_v48, 0  ;;  %v2603_v48 = vsel %vm1659_vm3, %v4414_v14, 0 }
 0x1ed   : > { %v2428_v37 = vmax.f32 %v2010_v32, 0.0  ;;  %v2002_v62 = vadd.f32 %v4402_v51, %v2001_v33  ;;  %v2530_v61 = vpack.c.bf16 %v2408_v24, %v2407_v29 }
 0x1ee   : > { %v3683_v40 = vpop.f32.mrf.mxu1  ;;  %v2529_v63 = vpack.c.bf16 %v2406_v50, %v2405_v45  ;;  %v2600_v45 = vsel %vm1659_vm3, %v4419_v21, 0 }
 0x1ef   : > { %v2540_v44 = vpack.c.bf16 %v2428_v37, %v2427_v36  ;;  %v2426_v47 = vmax.f32 %v2002_v62, 0.0  ;;  %v2023_v12 = vadd.f32 %v3683_v40, %v4402_v51  ;;  %v2421_v40 = vmax.f32 %v1983_v38, 0.0 }
 0x1f0   : > { %v2014_v53 = vpop.f32.mrf.mxu1  ;;  %v2612_v9 = vsel %vm1659_vm3, %v2529_v63, 0 }
 0x1f1   : > { %v2539_v55 = vpack.c.bf16 %v2426_v47, %v2425_v43  ;;  %3777 = vmatprep.subr.msk.bf16.mxu0 %vm1659_vm3, %v2540_v44  ;;  %v2015_v2 = vadd.f32 %v4402_v51, %v2014_v53  ;;  %v2431_v11 = vmax.f32 %v2023_v12, 0.0  ;;  %v2537_v54 = vpack.c.bf16 %v2422_v35, %v2421_v40 }
 0x1f2   : > { %v3684_v60 = vpop.f32.mrf.mxu1  ;;  %3442 = vmatpush3.bf16.xpose.msra.mxu0 %v2621_v58  ;;  %v2615_v12 = vsel %vm1659_vm3, %v2530_v61, 0  ;;  %v1951_v35 = vadd.f32 %v4402_v51, %v4466_v22 }
 0x1f3   : > { %v2026_v4 = vadd.f32 %v3684_v60, %v4402_v51  ;;  %3778 = vmatprep.subr.msk.bf16.mxu0 %vm1659_vm3, %v2539_v55  ;;  %v2429_v18 = vmax.f32 %v2015_v2, 0.0  ;;  %v2420_v2 = vmax.f32 %v1978_v57, 0.0 }
 0x1f4   : > { %v2017_v8 = vpop.f32.mrf.mxu1  ;;  %v2413_v39 = vmax.f32 %v1951_v35, 0.0 }
 0x1f5   : > { %v2432_v13 = vmax.f32 %v2026_v4, 0.0  ;;  %v2018_v15 = vadd.f32 %v4402_v51, %v2017_v8  ;;  %v2536_v7 = vpack.c.bf16 %v2420_v2, %v2419_v56  ;;  %v1970_v8 = vadd.f32 %v4402_v51, %v4487_v0 }
 0x1f6   : > { %v3687_v16 = vpop.f32.mrf.mxu1  ;;  %v2609_v0 = vsel %vm1659_vm3, %v4429_v42, 0 }
 0x1f7   : > { %v4533_v19 = vpack.c.bf16 %v2432_v13, %v2431_v11  ;;  %v2430_v23 = vmax.f32 %v2018_v15, 0.0  ;;  %v2039_v28 = vadd.f32 %v3687_v16, %v4402_v51  ;;  %v2418_v15 = vmax.f32 %v1970_v8, 0.0 }
 0x1f8   : > { %v2030_v25 = vpop.f32.mrf.mxu1  ;;  %v2417_v16 = vmax.f32 %v1967_v41, 0.0 }
 0x1f9   : > { %v4537_v27 = vpack.c.bf16 %v2430_v23, %v2429_v18  ;;  %v2031_v31 = vadd.f32 %v4402_v51, %v2030_v25  ;;  %v2435_v36 = vmax.f32 %v2039_v28, 0.0 }
 0x1fa   : > { %v3688_v30 = vpop.f32.mrf.mxu1  ;;  %3444 = vmatpush3.bf16.xpose.msra.mxu0 %v2618_v52  ;;  %v2535_v18 = vpack.c.bf16 %v2418_v15, %v2417_v16 }
 0x1fb   : > { %v2042_v32 = vadd.f32 %v3688_v30, %v4402_v51  ;;  %3779 = vmatprep.subr.msk.bf16.mxu0 %vm1659_vm3, %v2538_v26  ;;  %v2433_v43 = vmax.f32 %v2031_v31, 0.0 }
 0x1fc   : > { %v2033_v33 = vpop.f32.mrf.mxu1 }
 0x1fd   : > { %v2436_v37 = vmax.f32 %v2042_v32, 0.0  ;;  %v2034_v62 = vadd.f32 %v4402_v51, %v2033_v33  ;;  %v1954_v32 = vadd.f32 %v4402_v51, %v4471_v34 }
 0x1fe   : > { %v4550_v10 = vpop.f32.mrf.mxu1 }
 0x1ff   : > { %v4552_v44 = vpack.c.bf16 %v2436_v37, %v2435_v36  ;;  %v2434_v47 = vmax.f32 %v2034_v62, 0.0  ;;  %v2414_v37 = vmax.f32 %v1954_v32, 0.0 }
 0x200   : > { %v4554_v53 = vpop.f32.mrf.mxu1 }
 0x201   : > { %v4558_v55 = vpack.c.bf16 %v2434_v47, %v2433_v43  ;;  %v2533_v40 = vpack.c.bf16 %v2414_v37, %v2413_v39  ;;  %v2055_v37 = vadd.f32 %v4550_v10, %v4402_v51 }
 0x202   : > { %v4561_v58 = vpop.f32.mrf.mxu1  ;;  %3446 = vmatpush3.bf16.xpose.msra.mxu0 %v2615_v12 }
 0x203   : > { %3780 = vmatprep.subr.msk.bf16.mxu0 %vm1659_vm3, %v2537_v54 }
 0x204   : > { %v4566_v60 = vpop.f32.mrf.mxu1 }
 0x206   : > { %v3695_v4 = vpop.f32.mrf.mxu1 }
 0x208   : > { %v4568_v5 = vpop.f32.mrf.mxu1 }
 0x209   : > { %v2063_v41 = vadd.f32 %v4402_v51, %v4568_v5 }
 0x20a   : > { %v3696_v11 = vpop.f32.mrf.mxu1  ;;  %3448 = vmatpush3.bf16.xpose.msra.mxu0 %v2612_v9 }
 0x20b   : > { %3781 = vmatprep.subr.msk.bf16.mxu0 %vm1659_vm3, %v2536_v7  ;;  %v2074_v22 = vadd.f32 %v3696_v11, %v4402_v51 }
 0x20c   : > { %v2065_v13 = vpop.f32.mrf.mxu1 }
 0x20d   : > { %v2444_v54 = vmax.f32 %v2074_v22, 0.0  ;;  %v2066_v56 = vadd.f32 %v4402_v51, %v2065_v13 }
 0x20e   : > { %v3699_v6 = vpop.f32.mrf.mxu1 }
 0x20f   : > { %v2087_v23 = vadd.f32 %v3699_v6, %v4402_v51 }
 0x210   : > { %v2078_v17 = vpop.f32.mrf.mxu1 }
 0x211   : > { %v2079_v25 = vadd.f32 %v4402_v51, %v2078_v17  ;;  %v2447_v26 = vmax.f32 %v2087_v23, 0.0  ;;  %v2442_v17 = vmax.f32 %v2066_v56, 0.0 }
 0x212   : > { %v3700_v24 = vpop.f32.mrf.mxu1  ;;  %3450 = vmatpush3.bf16.xpose.msra.mxu0 %v2609_v0 }
 0x213   : > { %v2090_v52 = vadd.f32 %v3700_v24, %v4402_v51  ;;  %3782 = vmatprep.subr.msk.bf16.mxu0 %vm1659_vm3, %v2535_v18  ;;  %v2445_v30 = vmax.f32 %v2079_v25, 0.0  ;;  %v2441_v25 = vmax.f32 %v2063_v41, 0.0 }
 0x214   : > { %v2081_v49 = vpop.f32.mrf.mxu1 }
 0x215   : > { %v2448_v1 = vmax.f32 %v2090_v52, 0.0  ;;  %v2082_v28 = vadd.f32 %v4402_v51, %v2081_v49 }
 0x216   : > { %v4583_v29 = vpop.f32.mrf.mxu1 }
 0x217   : > { %v4585_v38 = vpack.c.bf16 %v2448_v1, %v2447_v26  ;;  %v2446_v31 = vmax.f32 %v2082_v28, 0.0  ;;  %v2058_v1 = vadd.f32 %v4561_v58, %v4402_v51  ;;  %v2547_v28 = vpack.c.bf16 %v2442_v17, %v2441_v25 }
 0x218   : > { %v4587_v42 = vpop.f32.mrf.mxu1 }
 0x219   : > { %v4591_v61 = vpack.c.bf16 %v2446_v31, %v2445_v30  ;;  %v2440_v22 = vmax.f32 %v2058_v1, 0.0 }
 0x21a   : > { %v4595_v33 = vpop.f32.mrf.mxu1  ;;  %3452 = vmatpush3.bf16.xpose.msra.mxu0 %v2606_v20 }
 0x21b   : > { %3783 = vmatprep.subr.msk.bf16.mxu0 %vm1659_vm3, %v4478_v46  ;;  %v2071_v46 = vadd.f32 %v3695_v4, %v4402_v51 }
 0x21c   : > { %v4601_v36 = vpop.f32.mrf.mxu1 }
 0x21d   : > { %v2443_v14 = vmax.f32 %v2071_v46, 0.0 }
 0x21e   : > { %v3707_v62 = vpop.f32.mrf.mxu1 }
 0x21f   : > { %v2548_v8 = vpack.c.bf16 %v2444_v54, %v2443_v14  ;;  %v2119_v52 = vadd.f32 %v3707_v62, %v4402_v51 }
 0x220   : > { %v4603_v34 = vpop.f32.mrf.mxu1 }
 0x221   : > { %v2669_v13 = vsel %vm1659_vm3, %v2548_v8, 0  ;;  %v2455_v39 = vmax.f32 %v2119_v52, 0.0 }
 0x222   : > { %v3708_v43 = vpop.f32.mrf.mxu1  ;;  %3454 = vmatpush3.bf16.xpose.msra.mxu0 %v2603_v48 }
 0x223   : > { %3784 = vmatprep.subr.msk.bf16.mxu0 %vm1659_vm3, %v2533_v40  ;;  %v2122_v23 = vadd.f32 %v3708_v43, %v4402_v51 }
 0x224   : > { %v2113_v47 = vpop.f32.mrf.mxu1 }
 0x225   : > { %v2456_v31 = vmax.f32 %v2122_v23, 0.0 }
 0x226   : > { %v3711_v50 = vpop.f32.mrf.mxu1 }
 0x227   : > { %v2135_v12 = vadd.f32 %v3711_v50, %v4402_v51  ;;  %v2666_v50 = vsel %vm1659_vm3, %v2547_v28, 0  ;;  %v2554_v46 = vpack.c.bf16 %v2456_v31, %v2455_v39  ;;  %v2098_v28 = vadd.f32 %v4402_v51, %v4601_v36 }
 0x228   : > { %v2126_v57 = vpop.f32.mrf.mxu1 }
 0x229   : > { %v2127_v63 = vadd.f32 %v4402_v51, %v2126_v57  ;;  %v2459_v9 = vmax.f32 %v2135_v12, 0.0  ;;  %v2114_v57 = vadd.f32 %v4402_v51, %v2113_v47  ;;  %v2050_v47 = vadd.f32 %v4402_v51, %v4566_v60 }
 0x22a   : > { %v3712_v3 = vpop.f32.mrf.mxu1  ;;  %3456 = vmatpush3.bf16.xpose.msra.mxu0 %v2600_v45  ;;  %v2439_v45 = vmax.f32 %v2055_v37, 0.0  ;;  %v2106_v60 = vadd.f32 %v4595_v33, %v4402_v51 }
 0x22b   : > { %v2138_v2 = vadd.f32 %v3712_v3, %v4402_v51  ;;  %v2457_v21 = vmax.f32 %v2127_v63, 0.0  ;;  %v2111_v3 = vadd.f32 %v4402_v51, %v4603_v34 }
 0x22c   : > { %v2129_v7 = vpop.f32.mrf.mxu1  ;;  %v2452_v52 = vmax.f32 %v2106_v60, 0.0 }
 0x22d   : > { %v2460_v4 = vmax.f32 %v2138_v2, 0.0  ;;  %v2130_v11 = vadd.f32 %v4402_v51, %v2129_v7  ;;  %v2546_v2 = vpack.c.bf16 %v2440_v22, %v2439_v45  ;;  %v2454_v7 = vmax.f32 %v2114_v57, 0.0 }
 0x22e   : > { %v3715_v15 = vpop.f32.mrf.mxu1  ;;  %v2453_v41 = vmax.f32 %v2111_v3, 0.0 }
 0x22f   : > { %v2556_v6 = vpack.c.bf16 %v2460_v4, %v2459_v9  ;;  %v2458_v16 = vmax.f32 %v2130_v11, 0.0  ;;  %v2151_v24 = vadd.f32 %v3715_v15, %v4402_v51  ;;  %v2047_v11 = vadd.f32 %v4402_v51, %v4554_v53 }
 0x230   : > { %v2142_v18 = vpop.f32.mrf.mxu1 }
 0x231   : > { %v2555_v0 = vpack.c.bf16 %v2458_v16, %v2457_v21  ;;  %3785 = vmatprep.subr.msk.bf16.mxu1 %vm1659_vm3, %v2556_v6  ;;  %3458 = vmatmul.mubr.msk.bf16.vlgmr.msra.gmra.mxu0 %vm1659_vm3, %v4518_v59  ;;  %v2143_v49 = vadd.f32 %v4402_v51, %v2142_v18  ;;  %v2463_v32 = vmax.f32 %v2151_v24, 0.0  ;;  %v2438_v16 = vmax.f32 %v2050_v47, 0.0 }
 0x232   : > { %3460 = vmatpush3.bf16.xpose.msra.mxu1 %v2669_v13  ;;  %v3716_v5 = vpop.f32.mrf.mxu1  ;;  %3493 = vmatprep.mubr.msk.bf16.mxu0 %vm1659_vm3, %v4518_v59  ;;  %v2553_v18 = vpack.c.bf16 %v2454_v7, %v2453_v41  ;;  %v2437_v13 = vmax.f32 %v2047_v11, 0.0  ;;  %v2103_v24 = vadd.f32 %v4583_v29, %v4402_v51  ;;  %v2095_v29 = vadd.f32 %v4402_v51, %v4587_v42 }
 0x233   : > { %3786 = vmatprep.subr.msk.bf16.mxu1 %vm1659_vm3, %v2555_v0  ;;  %v2154_v26 = vadd.f32 %v3716_v5, %v4402_v51  ;;  %v2461_v40 = vmax.f32 %v2143_v49, 0.0  ;;  %v2663_v0 = vsel %vm1659_vm3, %v2546_v2, 0 }
 0x234   : > { %v2145_v30 = vpop.f32.mrf.mxu1  ;;  %v2545_v5 = vpack.c.bf16 %v2438_v16, %v2437_v13  ;;  %v2451_v33 = vmax.f32 %v2103_v24, 0.0  ;;  %v2449_v37 = vmax.f32 %v2095_v29, 0.0 }
 0x235   : > { %v2464_v20 = vmax.f32 %v2154_v26, 0.0  ;;  %v2146_v35 = vadd.f32 %v4402_v51, %v2145_v30 }
 0x236   : > { %v3719_v62 = vpop.f32.mrf.mxu1  ;;  %v2552_v1 = vpack.c.bf16 %v2452_v52, %v2451_v33  ;;  %v2660_v30 = vsel %vm1659_vm3, %v2545_v5, 0 }
 0x237   : > { %v4636_v48 = vpack.c.bf16 %v2464_v20, %v2463_v32  ;;  %v2462_v43 = vmax.f32 %v2146_v35, 0.0  ;;  %v2167_v12 = vadd.f32 %v3719_v62, %v4402_v51  ;;  %v2450_v20 = vmax.f32 %v2098_v28, 0.0 }
 0x238   : > { %v2158_v58 = vpop.f32.mrf.mxu1 }
 0x239   : > { %v4640_v54 = vpack.c.bf16 %v2462_v43, %v2461_v40  ;;  %v2159_v14 = vadd.f32 %v4402_v51, %v2158_v58  ;;  %v2467_v8 = vmax.f32 %v2167_v12, 0.0  ;;  %v2551_v39 = vpack.c.bf16 %v2450_v20, %v2449_v37 }
 0x23a   : > { %3462 = vmatpush3.bf16.xpose.msra.mxu1 %v2666_v50  ;;  %v3720_v10 = vpop.f32.mrf.mxu1  ;;  %v2657_v40 = vsel %vm1659_vm3, %v4552_v44, 0 }
 0x23b   : > { %3787 = vmatprep.subr.msk.bf16.mxu1 %vm1659_vm3, %v2554_v46  ;;  %v2170_v63 = vadd.f32 %v3720_v10, %v4402_v51  ;;  %v2465_v15 = vmax.f32 %v2159_v14, 0.0 }
 0x23c   : > { %v2161_v56 = vpop.f32.mrf.mxu1 }
 0x23d   : > { %v2468_v9 = vmax.f32 %v2170_v63, 0.0  ;;  %v2162_v4 = vadd.f32 %v4402_v51, %v2161_v56  ;;  %v2654_v63 = vsel %vm1659_vm3, %v4558_v55, 0 }
 0x23e   : > { %v4653_v34 = vpop.f32.mrf.mxu1 }
 0x23f   : > { %v4655_v21 = vpack.c.bf16 %v2468_v9, %v2467_v8  ;;  %v2466_v6 = vmax.f32 %v2162_v4, 0.0  ;;  %v2651_v8 = vsel %vm1659_vm3, %v4533_v19, 0 }
 0x240   : > { %v4657_v17 = vpop.f32.mrf.mxu1 }
 0x241   : > { %v4661_v23 = vpack.c.bf16 %v2466_v6, %v2465_v15  ;;  %v2648_v6 = vsel %vm1659_vm3, %v4537_v27, 0 }
 0x242   : > { %3464 = vmatpush3.bf16.xpose.msra.mxu1 %v2663_v0  ;;  %v4664_v53 = vpop.f32.mrf.mxu1 }
 0x243   : > { %3788 = vmatprep.subr.msk.bf16.mxu1 %vm1659_vm3, %v2553_v18 }
 0x244   : > { %v4669_v25 = vpop.f32.mrf.mxu1 }
 0x246   : > { %v3727_v49 = vpop.f32.mrf.mxu1 }
 0x247   : > { %v2199_v41 = vadd.f32 %v3727_v49, %v4402_v51 }
 0x248   : > { %v2190_v26 = vpop.f32.mrf.mxu1 }
 0x249   : > { %v2475_v60 = vmax.f32 %v2199_v41, 0.0  ;;  %v2191_v33 = vadd.f32 %v4402_v51, %v2190_v26 }
 0x24a   : > { %3466 = vmatpush3.bf16.xpose.msra.mxu1 %v2660_v30  ;;  %v3728_v31 = vpop.f32.mrf.mxu1 }
 0x24b   : > { %3789 = vmatprep.subr.msk.bf16.mxu1 %vm1659_vm3, %v2552_v1  ;;  %v2202_v4 = vadd.f32 %v3728_v31, %v4402_v51 }
 0x24c   : > { %v2193_v32 = vpop.f32.mrf.mxu1 }
 0x24d   : > { %v2476_v15 = vmax.f32 %v2202_v4, 0.0  ;;  %v2194_v0 = vadd.f32 %v4402_v51, %v2193_v32 }
 0x24e   : > { %v3731_v35 = vpop.f32.mrf.mxu1 }
 0x24f   : > { %v2215_v36 = vadd.f32 %v3731_v35, %v4402_v51  ;;  %v2564_v24 = vpack.c.bf16 %v2476_v15, %v2475_v60  ;;  %v2474_v31 = vmax.f32 %v2194_v0, 0.0 }
 0x250   : > { %v2206_v62 = vpop.f32.mrf.mxu1 }
 0x251   : > { %v2207_v22 = vadd.f32 %v4402_v51, %v2206_v62  ;;  %v2479_v58 = vmax.f32 %v2215_v36, 0.0  ;;  %v2717_v32 = vsel %vm1659_vm3, %v2564_v24, 0  ;;  %v2473_v62 = vmax.f32 %v2191_v33, 0.0  ;;  %v4753_v33 = vld [vmem:[%s4919_s2 + $0x1] ss:$0 sm:$0xff] }
 0x252   : > { %3468 = vmatpush3.bf16.xpose.msra.mxu1 %v2657_v40  ;;  %v3732_v43 = vpop.f32.mrf.mxu1 }
 0x253   : > { %3790 = vmatprep.subr.msk.bf16.mxu1 %vm1659_vm3, %v2551_v39  ;;  %v2218_v42 = vadd.f32 %v3732_v43, %v4402_v51  ;;  %v2477_v45 = vmax.f32 %v2207_v22, 0.0  ;;  %v2590_v39 = vld [vmem:[%s4921_s4] sm:$0xff]  ;;  %v4016_v22 = vmov 0  }
 0x254   : > { %v2209_v50 = vpop.f32.mrf.mxu1  ;;  %3850 = vset.pattern.permute.xlu0 %v4016_v22 }
 0x255   : > { %v2480_v46 = vmax.f32 %v2218_v42, 0.0  ;;  %v2210_v57 = vadd.f32 %v4402_v51, %v2209_v50  ;;  %v2186_v42 = vadd.f32 %v4664_v53, %v4402_v51  ;;  %v2563_v50 = vpack.c.bf16 %v2474_v31, %v2473_v62  ;;  %2593 = vperm.xlu0 %3850, %v2590_v39  }
 0x256   : > { %v4684_v12 = vpop.f32.mrf.mxu1 }
 0x257   : > { %v4686_v10 = vpack.c.bf16 %v2480_v46, %v2479_v58  ;;  %v2478_v44 = vmax.f32 %v2210_v57, 0.0  ;;  %v2472_v41 = vmax.f32 %v2186_v42, 0.0  ;;  %v2714_v53 = vsel %vm1659_vm3, %v2563_v50, 0 }
 0x258   : > { %v4688_v3 = vpop.f32.mrf.mxu1  ;;  %v2231_v62 = vadd.f32 %v4753_v33, %v4684_v12 }
 0x259   : > { %v4690_v14 = vpack.c.bf16 %v2478_v44, %v2477_v45  ;;  %v2223_v12 = vadd.f32 %v4753_v33, %v4688_v3 }
 0x25a   : > { %3470 = vmatpush3.bf16.xpose.msra.mxu1 %v2654_v63  ;;  %v4694_v2 = vpop.f32.mrf.mxu1  ;;  %v2183_v63 = vadd.f32 %v4653_v34, %v4402_v51 }
 0x25b   : > { %3791 = vmatprep.subr.msk.bf16.mxu1 %vm1659_vm3, %v4585_v38 }
 0x25c   : > { %v4698_v47 = vpop.f32.mrf.mxu1  ;;  %v2471_v60 = vmax.f32 %v2183_v63, 0.0 }
 0x25d   : > { %v2226_v42 = vadd.f32 %v4753_v33, %v4698_v47 }
 0x25e   : > { %v3739_v56 = vpop.f32.mrf.mxu1 }
 0x25f   : > { %v2247_v40 = vadd.f32 %v3739_v56, %v4402_v51 }
 0x260   : > { %v4700_v7 = vpop.f32.mrf.mxu1 }
 0x261   : > { %v2239_v34 = vadd.f32 %v4402_v51, %v4700_v7 }
 0x262   : > { %3472 = vmatpush3.bf16.xpose.msra.mxu1 %v2651_v8  ;;  %v3740_v9 = vpop.f32.mrf.mxu1  ;;  %v2487_v8 = vmax.f32 %v2247_v40, 0.0 }
 0x263   : > { %3792 = vmatprep.subr.msk.bf16.mxu1 %vm1659_vm3, %v4591_v61  ;;  %v2250_v20 = vadd.f32 %v3740_v9, %v4402_v51 }
 0x264   : > { %v2241_v55 = vpop.f32.mrf.mxu1 }
 0x265   : > { %v2488_v46 = vmax.f32 %v2250_v20, 0.0 }
 0x266   : > { %v3743_v11 = vpop.f32.mrf.mxu1 }
 0x267   : > { %v2263_v16 = vadd.f32 %v3743_v11, %v4402_v51  ;;  %v2570_v15 = vpack.c.bf16 %v2488_v46, %v2487_v8 }
 0x268   : > { %v2254_v38 = vpop.f32.mrf.mxu1 }
 0x269   : > { %v2255_v18 = vadd.f32 %v4402_v51, %v2254_v38  ;;  %v2491_v5 = vmax.f32 %v2263_v16, 0.0 }
 0x26a   : > { %3474 = vmatpush3.bf16.xpose.msra.mxu1 %v2648_v6  ;;  %v3744_v19 = vpop.f32.mrf.mxu1  ;;  %v2242_v6 = vadd.f32 %v4402_v51, %v2241_v55  ;;  %v2178_v55 = vadd.f32 %v4402_v51, %v4669_v25 }
 0x26b   : > { %v2266_v61 = vadd.f32 %v3744_v19, %v4402_v51  ;;  %v2489_v1 = vmax.f32 %v2255_v18, 0.0 }
 0x26c   : > { %v2257_v13 = vpop.f32.mrf.mxu1  ;;  %v2470_v25 = vmax.f32 %v2178_v55, 0.0 }
 0x26d   : > { %v2492_v52 = vmax.f32 %v2266_v61, 0.0  ;;  %v2258_v49 = vadd.f32 %v4402_v51, %v2257_v13  ;;  %v2562_v13 = vpack.c.bf16 %v2472_v41, %v2471_v60 }
 0x26e   : > { %v3747_v27 = vpop.f32.mrf.mxu1 }
 0x26f   : > { %v2572_v28 = vpack.c.bf16 %v2492_v52, %v2491_v5  ;;  %v2490_v30 = vmax.f32 %v2258_v49, 0.0  ;;  %v2279_v37 = vadd.f32 %v3747_v27, %v4402_v51  ;;  %v2486_v5 = vmax.f32 %v2242_v6, 0.0 }
 0x270   : > { %v2270_v29 = vpop.f32.mrf.mxu1  ;;  %v2175_v27 = vadd.f32 %v4753_v33, %v4657_v17 }
 0x271   : > { %v2571_v35 = vpack.c.bf16 %v2490_v30, %v2489_v1  ;;  %3793 = vmatprep.subr.msk.bf16.mxu0 %vm1659_vm3, %v2572_v28  ;;  %3476 = vmatmul.mubr.msk.bf16.vlgmr.msra.gmra.mxu1 %vm1659_vm3, %v4518_v59  ;;  %v2271_v36 = vadd.f32 %v4402_v51, %v2270_v29  ;;  %v2495_v57 = vmax.f32 %v2279_v37, 0.0  ;;  %v2485_v1 = vmax.f32 %v2239_v34, 0.0 }
 0x272   : > { %v3748_v26 = vpop.f32.mrf.mxu1  ;;  %3478 = vmatpush3.bf16.xpose.msra.mxu0 %v2717_v32  ;;  %3511 = vmatprep.mubr.msk.bf16.mxu1 %vm1659_vm3, %v4518_v59  ;;  %v2234_v29 = vadd.f32 %v4753_v33, %v4694_v2  ;;  %v2711_v32 = vsel %vm1659_vm3, %v2562_v13, 0  ;;  %v2469_v17 = vmax.f32 %v2175_v27, 0.0  ;;  %v2483_v2 = vmax.f32 %v2231_v62, 0.0 }
 0x273   : > { %v2282_v43 = vadd.f32 %v3748_v26, %v4402_v51  ;;  %3794 = vmatprep.subr.msk.bf16.mxu0 %vm1659_vm3, %v2571_v35  ;;  %v2493_v9 = vmax.f32 %v2271_v36, 0.0  ;;  %v2569_v20 = vpack.c.bf16 %v2486_v5, %v2485_v1 }
 0x274   : > { %v2273_v58 = vpop.f32.mrf.mxu1  ;;  %v2561_v39 = vpack.c.bf16 %v2470_v25, %v2469_v17  ;;  %v2484_v40 = vmax.f32 %v2234_v29, 0.0 }
 0x275   : > { %v2496_v45 = vmax.f32 %v2282_v43, 0.0  ;;  %v2274_v44 = vadd.f32 %v4402_v51, %v2273_v58 }
 0x276   : > { %v3751_v56 = vpop.f32.mrf.mxu1  ;;  %v2568_v22 = vpack.c.bf16 %v2484_v40, %v2483_v2  ;;  %v2708_v58 = vsel %vm1659_vm3, %v2561_v39, 0 }
 0x277   : > { %v4736_v4 = vpack.c.bf16 %v2496_v45, %v2495_v57  ;;  %v2494_v11 = vmax.f32 %v2274_v44, 0.0  ;;  %v2295_v19 = vadd.f32 %v3751_v56, %v4402_v51  ;;  %v2482_v57 = vmax.f32 %v2226_v42, 0.0 }
 0x278   : > { %v2286_v38 = vpop.f32.mrf.mxu1  ;;  %v2481_v44 = vmax.f32 %v2223_v12, 0.0 }
 0x279   : > { %v4740_v16 = vpack.c.bf16 %v2494_v11, %v2493_v9  ;;  %v2287_v61 = vadd.f32 %v4402_v51, %v2286_v38  ;;  %v2499_v52 = vmax.f32 %v2295_v19, 0.0  ;;  %v2705_v9 = vsel %vm1659_vm3, %v4655_v21, 0 }
 0x27a   : > { %v3752_v18 = vpop.f32.mrf.mxu1  ;;  %3480 = vmatpush3.bf16.xpose.msra.mxu0 %v2714_v53  ;;  %v2567_v56 = vpack.c.bf16 %v2482_v57, %v2481_v44 }
 0x27b   : > { %v2298_v0 = vadd.f32 %v3752_v18, %v4402_v51  ;;  %3795 = vmatprep.subr.msk.bf16.mxu0 %vm1659_vm3, %v2570_v15  ;;  %v2497_v28 = vmax.f32 %v2287_v61, 0.0  ;;  %v2702_v61 = vsel %vm1659_vm3, %v4661_v23, 0 }
 0x27c   : > { %v2289_v24 = vpop.f32.mrf.mxu1 }
 0x27d   : > { %v2500_v49 = vmax.f32 %v2298_v0, 0.0  ;;  %v2290_v7 = vadd.f32 %v4753_v33, %v2289_v24 }
 0x27e   : > { %v4760_v51 = vpop.f32.mrf.mxu1 }
 0x27f   : > { %v4758_v30 = vpack.c.bf16 %v2500_v49, %v2499_v52  ;;  %v2498_v31 = vmax.f32 %v2290_v7, 0.0  ;;  %v2699_v52 = vsel %vm1659_vm3, %v4636_v48, 0 }
 0x280   : > { %v4766_v37 = vpop.f32.mrf.mxu1 }
 0x281   : > { %v4764_v35 = vpack.c.bf16 %v2498_v31, %v2497_v28 }
 0x282   : > { %3482 = vmatpush3.bf16.xpose.msra.mxu0 %v2711_v32  ;;  %v4771_v26 = vpop.f32.mrf.mxu1 }
 0x283   : > { %3796 = vmatprep.subr.msk.bf16.mxu0 %vm1659_vm3, %v2569_v20 }
 0x284   : > { %v4774_v36 = vpop.f32.mrf.mxu1 }
 0x286   : > { %v3759_v43 = vpop.f32.mrf.mxu1 }
 0x287   : > { %v2327_v1 = vadd.f32 %v4753_v33, %v3759_v43 }
 0x288   : > { %v2318_v50 = vpop.f32.mrf.mxu1 }
 0x289   : > { %v2507_v29 = vmax.f32 %v2327_v1, 0.0 }
 0x28a   : > { %3484 = vmatpush3.bf16.xpose.msra.mxu0 %v2708_v58  ;;  %v3760_v46 = vpop.f32.mrf.mxu1 }
 0x28b   : > { %3797 = vmatprep.subr.msk.bf16.mxu0 %vm1659_vm3, %v2568_v22  ;;  %v2330_v7 = vadd.f32 %v4753_v33, %v3760_v46 }
 0x28c   : > { %v2321_v45 = vpop.f32.mrf.mxu1 }
 0x28d   : > { %v2508_v31 = vmax.f32 %v2330_v7, 0.0  ;;  %v2322_v32 = vadd.f32 %v4753_v33, %v2321_v45 }
 0x28e   : > { %v3763_v63 = vpop.f32.mrf.mxu1 }
 0x28f   : > { %v2343_v47 = vadd.f32 %v4753_v33, %v3763_v63  ;;  %v2580_v62 = vpack.c.bf16 %v2508_v31, %v2507_v29  ;;  %v2506_v58 = vmax.f32 %v2322_v32, 0.0  ;;  %v2753_v31 = vsel %vm1659_vm3, %v4758_v30, 0 }
 0x290   : > { %v2334_v8 = vpop.f32.mrf.mxu1  ;;  %v2744_v30 = vsel %vm1659_vm3, %v4740_v16, 0 }
 0x291   : > { %v2335_v3 = vadd.f32 %v4753_v33, %v2334_v8  ;;  %v2511_v53 = vmax.f32 %v2343_v47, 0.0  ;;  %v2765_v57 = vsel %vm1659_vm3, %v2580_v62, 0  ;;  %v2311_v8 = vadd.f32 %v4753_v33, %v4760_v51 }
 0x292   : > { %3486 = vmatpush3.bf16.xpose.msra.mxu0 %v2705_v9  ;;  %v3764_v11 = vpop.f32.mrf.mxu1  ;;  %v2303_v51 = vadd.f32 %v4753_v33, %v4766_v37 }
 0x293   : > { %3798 = vmatprep.subr.msk.bf16.mxu0 %vm1659_vm3, %v2567_v56  ;;  %v2346_v41 = vadd.f32 %v4753_v33, %v3764_v11  ;;  %v2509_v60 = vmax.f32 %v2335_v3, 0.0 }
 0x294   : > { %v2337_v38 = vpop.f32.mrf.mxu1 }
 0x295   : > { %v2512_v15 = vmax.f32 %v2346_v41, 0.0  ;;  %v2338_v6 = vadd.f32 %v4753_v33, %v2337_v38  ;;  %v2503_v38 = vmax.f32 %v2311_v8, 0.0 }
 0x296   : > { %v4789_v19 = vpop.f32.mrf.mxu1 }
 0x297   : > { %v4791_v18 = vpack.c.bf16 %v2512_v15, %v2511_v53  ;;  %v2510_v21 = vmax.f32 %v2338_v6, 0.0 }
 0x298   : > { %v4793_v34 = vpop.f32.mrf.mxu1 }
 0x299   : > { %v4797_v0 = vpack.c.bf16 %v2510_v21, %v2509_v60 }
 0x29a   : > { %3488 = vmatpush3.bf16.xpose.msra.mxu0 %v2702_v61  ;;  %v3768_v13 = vpop.f32.mrf.mxu1 }
 0x29b   : > { %3799 = vmatprep.subr.msk.bf16.mxu0 %vm1659_vm3, %v4686_v10  ;;  %v2696_v10 = vsel %vm1659_vm3, %v4640_v54, 0  ;;  %v2319_v54 = vadd.f32 %v4753_v33, %v2318_v50  ;;  %v2314_v50 = vadd.f32 %v4753_v33, %v4771_v26  ;;  %v2306_v26 = vadd.f32 %v4753_v33, %v4774_v36 }
 0x29c   : > { %v4801_v55 = vpop.f32.mrf.mxu1  ;;  %v2362_v61 = vadd.f32 %v4753_v33, %v3768_v13  ;;  %v2351_v13 = vadd.f32 %v4753_v33, %v4793_v34 }
 0x29d   : > { %v2505_v45 = vmax.f32 %v2319_v54, 0.0  ;;  %v2504_v47 = vmax.f32 %v2314_v50, 0.0  ;;  %v2502_v21 = vmax.f32 %v2306_v26, 0.0  ;;  %v2354_v37 = vadd.f32 %v4753_v33, %v4801_v55 }
 0x29e   : > { %v3771_v24 = vpop.f32.mrf.mxu1  ;;  %v2516_v36 = vmax.f32 %v2362_v61, 0.0  ;;  %v2750_v55 = vsel %vm1659_vm3, %v4764_v35, 0 }
 0x29f   : > { %v2375_v44 = vadd.f32 %v4753_v33, %v3771_v24  ;;  %v2579_v63 = vpack.c.bf16 %v2506_v58, %v2505_v45  ;;  %v2578_v15 = vpack.c.bf16 %v2504_v47, %v2503_v38 }
 0x2a0   : > { %v2366_v5 = vpop.f32.mrf.mxu1 }
 0x2a1   : > { %v2519_v9 = vmax.f32 %v2375_v44, 0.0  ;;  %v2762_v41 = vsel %vm1659_vm3, %v2579_v63, 0  ;;  %v2367_v53 = vadd.f32 %v4753_v33, %v2366_v5  ;;  %v2359_v5 = vadd.f32 %v4753_v33, %v4789_v19 }
 0x2a2   : > { %3490 = vmatpush3.bf16.xpose.msra.mxu0 %v2699_v52  ;;  %v3772_v49 = vpop.f32.mrf.mxu1  ;;  %v2759_v52 = vsel %vm1659_vm3, %v2578_v15, 0 }
 0x2a3   : > { %3800 = vmatprep.subr.msk.bf16.mxu0 %vm1659_vm3, %v4690_v14  ;;  %v2378_v12 = vadd.f32 %v4753_v33, %v3772_v49  ;;  %v2517_v60 = vmax.f32 %v2367_v53, 0.0  ;;  %v2501_v49 = vmax.f32 %v2303_v51, 0.0  ;;  %v2515_v7 = vmax.f32 %v2359_v5, 0.0 }
 0x2a4   : > { %v2369_v23 = vpop.f32.mrf.mxu1 }
 0x2a5   : > { %v2520_v56 = vmax.f32 %v2378_v12, 0.0  ;;  %v2370_v3 = vadd.f32 %v4753_v33, %v2369_v23  ;;  %v2577_v23 = vpack.c.bf16 %v2502_v21, %v2501_v49 }
 0x2a6   : > { %v3775_v27 = vpop.f32.mrf.mxu1 }
 0x2a7   : > { %v2391_v25 = vadd.f32 %v4753_v33, %v3775_v27  ;;  %v2586_v11 = vpack.c.bf16 %v2520_v56, %v2519_v9  ;;  %v2518_v6 = vmax.f32 %v2370_v3, 0.0  ;;  %v2584_v27 = vpack.c.bf16 %v2516_v36, %v2515_v7 }
 0x2a8   : > { %v2382_v28 = vpop.f32.mrf.mxu1  ;;  %v2756_v1 = vsel %vm1659_vm3, %v2577_v23, 0 }
 0x2a9   : > { %v2383_v20 = vadd.f32 %v4753_v33, %v2382_v28  ;;  %v2523_v39 = vmax.f32 %v2391_v25, 0.0  ;;  %v2585_v24 = vpack.c.bf16 %v2518_v6, %v2517_v60  ;;  %v2514_v28 = vmax.f32 %v2354_v37, 0.0 }
 0x2aa   : > { %3492 = vmatpush3.bf16.xpose.msra.mxu0 %v2696_v10  ;;  %v3776_v48 = vpop.f32.mrf.mxu1  ;;  %v2513_v10 = vmax.f32 %v2351_v13, 0.0 }
 0x2ab   : > { %v2394_v14 = vadd.f32 %v4753_v33, %v3776_v48  ;;  %v2521_v43 = vmax.f32 %v2383_v20, 0.0 }
 0x2ac   : > { %v2385_v17 = vpop.f32.mrf.mxu1  ;;  %v2583_v19 = vpack.c.bf16 %v2514_v28, %v2513_v10 }
 0x2ad   : > { %v2524_v40 = vmax.f32 %v2394_v14, 0.0  ;;  %v2386_v2 = vadd.f32 %v4753_v33, %v2385_v17  ;;  %v2747_v33 = vsel %vm1659_vm3, %v4736_v4, 0 }
 0x2af   : > { %v2588_v22 = vpack.c.bf16 %v2524_v40, %v2523_v39  ;;  %v2522_v42 = vmax.f32 %v2386_v2, 0.0 }
 0x2b1   : > { %3494 = vmatmul.mubr.msk.bf16.vlgmr.msra.gmra.mxu0 %vm1659_vm3, %v4518_v59  ;;  %3801 = vmatprep.subr.msk.bf16.mxu1 %vm1659_vm3, %v2588_v22  ;;  %v2587_v46 = vpack.c.bf16 %v2522_v42, %v2521_v43 }
 0x2b2   : > { %3496 = vmatpush3.bf16.xpose.msra.mxu1 %v2765_v57 }
 0x2b3   : > { %3802 = vmatprep.subr.msk.bf16.mxu1 %vm1659_vm3, %v2587_v46 }
 0x2ba   : > { %3498 = vmatpush3.bf16.xpose.msra.mxu1 %v2762_v41 }
 0x2bb   : > { %3803 = vmatprep.subr.msk.bf16.mxu1 %vm1659_vm3, %v2586_v11 }
 0x2c2   : > { %3500 = vmatpush3.bf16.xpose.msra.mxu1 %v2759_v52 }
 0x2c3   : > { %3804 = vmatprep.subr.msk.bf16.mxu1 %vm1659_vm3, %v2585_v24 }
 0x2ca   : > { %3502 = vmatpush3.bf16.xpose.msra.mxu1 %v2756_v1 }
 0x2cb   : > { %3805 = vmatprep.subr.msk.bf16.mxu1 %vm1659_vm3, %v2584_v27 }
 0x2d0   : > { %v4860_v34 = vpop.permute.xlu0 %2593 }
 0x2d2   : > { %3504 = vmatpush3.bf16.xpose.msra.mxu1 %v2753_v31 }
 0x2d3   : > { %3806 = vmatprep.subr.msk.bf16.mxu1 %vm1659_vm3, %v2583_v19 }
 0x2da   : > { %3506 = vmatpush3.bf16.xpose.msra.mxu1 %v2750_v55 }
 0x2db   : > { %3807 = vmatprep.subr.msk.bf16.mxu1 %vm1659_vm3, %v4791_v18 }
 0x2e2   : > { %3508 = vmatpush3.bf16.xpose.msra.mxu1 %v2747_v33 }
 0x2e3   : > { %3808 = vmatprep.subr.msk.bf16.mxu1 %vm1659_vm3, %v4797_v0 }
 0x2ea   : > { %3510 = vmatpush3.bf16.xpose.msra.mxu1 %v2744_v30 }
 0x2f1   : > { %v2825_v25 = vpop.f32.mrf.mxu0  ;;  %3512 = vmatmul.mubr.msk.bf16.vlgmr.msra.gmra.mxu1 %vm1659_vm3, %v4518_v59 }
 0x2f2   : > { %v2826_v35 = vadd.f32 %v2825_v25, %v4860_v34 }
 0x2f3   : > { %v2827_v18 = vpop.f32.mrf.mxu0 }
 0x2f4   : > { %v2828_v48 = vadd.f32 %v2827_v18, %v4860_v34  ;;  %v2955_v4 = vsub.f32 0.0, %v2826_v35 }
 0x2f5   : > { %v2829_v29 = vpop.f32.mrf.mxu0 }
 0x2f6   : > { %v2956_v0 = vsub.f32 0.0, %v2828_v48  ;;  %v2963_v20 = vmul.f32 1.442695, %v2955_v4 }
 0x2f7   : > { %v2830_v14 = vpop.f32.mrf.mxu0 }
 0x2f8   : > { %3919 = vpow2.f32 %v2963_v20  ;;  %v2965_v16 = vmul.f32 1.442695, %v2956_v0 }
 0x2fa   : > { %3921 = vpow2.f32 %v2965_v16 }
 0x305   : > { %v3920_v32 = vpop.eup %3919 }
 0x306   : > { %v2979_v17 = vadd.f32 1.0, %v3920_v32 }
 0x307   : > { %v3922_v62 = vpop.eup %3921 }
 0x308   : > { %v2980_v39 = vadd.f32 1.0, %v3922_v62  ;;  %3923 = vrcp.f32 %v2979_v17 }
 0x30a   : > { %3925 = vrcp.f32 %v2980_v39 }
 0x315   : > { %v3924_v59 = vpop.eup %3923 }
 0x317   : > { %v3926_v40 = vpop.eup %3925 }
 0x318   : > { %v3003_v2 = vcombine.low %v3924_v59, %v3926_v40 }
 0x31a   : > { %3011 = vst [vmem:[%s4869_s16] sm:$0x77] %v3003_v2 }
 0x331   : > { %v2866_v54 = vpop.f32.mrf.mxu1 }
 0x332   : > { %v2867_v43 = vadd.f32 %v2866_v54, %v4860_v34 }
 0x333   : > { %v2868_v22 = vpop.f32.mrf.mxu1 }
 0x334   : > { %v2869_v42 = vadd.f32 %v2868_v22, %v4860_v34  ;;  %v2957_v58 = vsub.f32 0.0, %v2867_v43 }
 0x335   : > { %v2870_v12 = vpop.f32.mrf.mxu1 }
 0x336   : > { %v2958_v46 = vsub.f32 0.0, %v2869_v42  ;;  %v2967_v57 = vmul.f32 1.442695, %v2957_v58 }
 0x337   : > { %v2871_v45 = vpop.f32.mrf.mxu1 }
 0x338   : > { %3927 = vpow2.f32 %v2967_v57  ;;  %v2969_v44 = vmul.f32 1.442695, %v2958_v46 }
 0x33a   : > { %3929 = vpow2.f32 %v2969_v44 }
 0x345   : > { %v3928_v50 = vpop.eup %3927 }
 0x346   : > { %v2981_v63 = vadd.f32 1.0, %v3928_v50 }
 0x347   : > { %v3930_v56 = vpop.eup %3929 }
 0x348   : > { %v2982_v8 = vadd.f32 1.0, %v3930_v56  ;;  %3931 = vrcp.f32 %v2981_v63 }
 0x34a   : > { %3933 = vrcp.f32 %v2982_v8 }
 0x355   : > { %v3932_v9 = vpop.eup %3931 }
 0x357   : > { %v3934_v47 = vpop.eup %3933 }
 0x358   : > { %v3004_v11 = vcombine.low %v3932_v9, %v3934_v47 }
 0x35a   : > { %3012 = vst [vmem:[%s4869_s16 + $0x8] sm:$0x77] %v3004_v11 }
 0x371   : > { %v2907_v3 = vpop.f32.mrf.mxu0 }
 0x372   : > { %v2908_v41 = vadd.f32 %v2907_v3, %v4860_v34 }
 0x373   : > { %v2909_v38 = vpop.f32.mrf.mxu0 }
 0x374   : > { %v2959_v53 = vsub.f32 0.0, %v2908_v41  ;;  %v2910_v15 = vadd.f32 %v2909_v38, %v4860_v34 }
 0x375   : > { %v2911_v26 = vpop.f32.mrf.mxu0 }
 0x376   : > { %v2971_v6 = vmul.f32 1.442695, %v2959_v53  ;;  %v2960_v51 = vsub.f32 0.0, %v2910_v15 }
 0x377   : > { %v2912_v60 = vpop.f32.mrf.mxu0 }
 0x378   : > { %3935 = vpow2.f32 %v2971_v6  ;;  %v2973_v21 = vmul.f32 1.442695, %v2960_v51 }
 0x37a   : > { %3937 = vpow2.f32 %v2973_v21 }
 0x385   : > { %v3936_v61 = vpop.eup %3935 }
 0x386   : > { %v2983_v24 = vadd.f32 1.0, %v3936_v61 }
 0x387   : > { %v3938_v52 = vpop.eup %3937 }
 0x388   : > { %3939 = vrcp.f32 %v2983_v24  ;;  %v2984_v49 = vadd.f32 1.0, %v3938_v52 }
 0x38a   : > { %3941 = vrcp.f32 %v2984_v49 }
 0x395   : > { %v3940_v5 = vpop.eup %3939 }
 0x397   : > { %v3942_v23 = vpop.eup %3941 }
 0x398   : > { %v3005_v36 = vcombine.low %v3940_v5, %v3942_v23 }
 0x39a   : > { %3013 = vst [vmem:[%s4869_s16 + $0x10] sm:$0x77] %v3005_v36 }
 0x3b1   : > { %v2948_v7 = vpop.f32.mrf.mxu1 }
 0x3b2   : > { %v2949_v27 = vadd.f32 %v2948_v7, %v4860_v34 }
 0x3b3   : > { %v2950_v37 = vpop.f32.mrf.mxu1 }
 0x3b4   : > { %v2961_v1 = vsub.f32 0.0, %v2949_v27  ;;  %v2951_v13 = vadd.f32 %v2950_v37, %v4860_v34 }
 0x3b5   : > { %v2952_v28 = vpop.f32.mrf.mxu1 }
 0x3b6   : > { %v2975_v10 = vmul.f32 1.442695, %v2961_v1  ;;  %v2962_v19 = vsub.f32 0.0, %v2951_v13 }
 0x3b7   : > { %v2953_v31 = vpop.f32.mrf.mxu1 }
 0x3b8   : > { %3943 = vpow2.f32 %v2975_v10  ;;  %v2977_v55 = vmul.f32 1.442695, %v2962_v19 }
 0x3ba   : > { %3945 = vpow2.f32 %v2977_v55 }
 0x3c5   : > { %v3944_v33 = vpop.eup %3943 }
 0x3c6   : > { %v2985_v30 = vadd.f32 1.0, %v3944_v33 }
 0x3c7   : > { %v3946_v25 = vpop.eup %3945 }
 0x3c8   : > { %v2986_v35 = vadd.f32 1.0, %v3946_v25  ;;  %3947 = vrcp.f32 %v2985_v30 }
 0x3ca   : > { %3949 = vrcp.f32 %v2986_v35 }
 0x3d5   : > { %v3948_v18 = vpop.eup %3947 }
 0x3d7   : > { %v3950_v34 = vpop.eup %3949 }
 0x3d8   : > { %v3006_v48 = vcombine.low %v3948_v18, %v3950_v34 }
 0x3da   : > { %3014 = vst [vmem:[%s4869_s16 + $0x18] sm:$0x77] %v3006_v48 }
 0x3db   : > { %3966 = shalt.err (!%p3963_p3)
}
 0x3dc   : > { %s3967_s10 = scalar_lea.hbm %s3028_s30, 512  ;;  %s3971_s13 = scalar_lea.hbm %s4922_s5, 2048 }
 0x3dd   : > { %p3968_p4 = scmp.ne.s32.totalorder %s3028_s30, %s3967_s10  ;;  %p3972_p9 = scmp.lt.s32.totalorder %s3028_s30, %s4922_s5 }
 0x3de   : > { %p3973_p10 = scmp.lt.s32.totalorder %s3971_s13, %s3967_s10 }
 0x3df   : > { %p3969_p7 = pnand %p3968_p4, %p4086_p5 }
 0x3e0   : > { %p3974_p11 = por %p3973_p10, %p3972_p9 }
 0x3e1   : > { %p3970_p8 = pneg %p3969_p7 }
 0x3e3   : > { %p3975_p12 = pnand %p3974_p11, %p3970_p8 }
 0x3e5   : > { %3978 = shalt.err (!%p3975_p12)
}
 0x3e6   : > { %3809 = dma.vmem_to_hbm [thread:$0]  (%p4086_p5), %s3031_s23, 512, %s3028_s30, %s3016_s6  }
 0x3e7 PF: > { %p3815_p13 = scmp.ge.s32.totalorder %s4013_s21, 2  ;;  %s3042_s16 = sand.u32 1, %s4001_s18  }
 0x3e8   : > { %s3043_s17 = scalar_lea.sflag [#allocation3], %s3042_s16 }
 0x3e9   : > { %p3812_p0 = pnand %p3815_p13, %p4090_p6 }
 0x3eb   : > { %p3813_p1 = pneg %p3812_p0 }
 0x3ed   : > { %3996 = dma.done.wait (%p3813_p1), %s3043_s17, 512  }
 0x3ee   : > { %3998 = vsyncadd (%p3813_p1), %s3043_s17, 4294966784  ;;  %p15_p2 = scmp.ge.s32.totalorder %s4073_s24, 6   ;;  %s4925_s18 = smov %s4005_s19 }
 0x3ef   : > { %s4926_s19 = smov %s4009_s20  ;;  %s4927_s20 = smov %s4084_s27 }
 0x3f0   : > { %s4928_s21 = smov %s4073_s24  ;;  %17 = sbr.rel (!%p15_p2) target bundleno = 3 (0x3), region = 77 }
 0x3f5   :  { %3048 = vsyncpa [#allocation3], 1 }
 0x3f6   :  { %3050 = vsyncpa [#allocation3 + $0x1], 1 }

</bundles_post_ra>
